<compile_context>
chip_gen: v6e
topology: v6e:2x2x1
jax: 0.10.0
libtpu: 0.0.40
codegen_flags: <defaults>
</compile_context>

<pallas_src>
import numpy as np
import jax
import jax.numpy as jnp
from jax import lax
from jax.experimental import pallas as pl
from jax.experimental.pallas import tpu as pltpu

X_SIZE = 3          # config['output model']['x size']
C_CELL = 4          # cell class logits
C_TRACK = 3         # track class logits
N_NODES = 128       # nodes per graph, lane aligned
SUB = 8             # graphs per grid step (sublane batch)

CONFIG = {
    'var transform': {
        'particle_pt':   {'mean': 8.2, 'std': 1.1},
        'particle_eta':  {'mean': 0.0, 'std': 1.5},
        'particle_xhat': {'mean': 0.0, 'std': 0.7},
        'particle_yhat': {'mean': 0.0, 'std': 0.7},
        'track_pt':      {'mean': 8.0, 'std': 1.2},
    },
    't_b': 0.3,
    't_d': 0.8,
    't_b_opt': [0.3],
    't_d_opt': [0.8],
    'bin_opt': [0.0, 9999.0],
    'output model': {'x size': X_SIZE},
}

_PI = float(np.pi)


# ----------------------------------------------------------------------------- in-kernel math
def _atan_f32(x):
    """Branchless Cephes-style float32 arctan (all-VPU: mul/add/div/where)."""
    ax = jnp.abs(x)
    big = ax > 2.414213562373095       # tan(3*pi/8)
    mid = ax > 0.4142135623730951      # tan(pi/8)
    safe = jnp.maximum(ax, 1e-30)
    z = jnp.where(big, -1.0 / safe, jnp.where(mid, (ax - 1.0) / (ax + 1.0), ax))
    off = jnp.where(big, _PI / 2.0, jnp.where(mid, _PI / 4.0, 0.0))
    z2 = z * z
    p = ((8.05374449538e-2 * z2 - 1.38776856032e-1) * z2
         + 1.99777106478e-1) * z2 - 3.33329491539e-1
    r = off + (p * z2 * z + z)
    return jnp.where(x < 0.0, -r, r)


def _atan2_f32(y, x):
    """torch.atan2-compatible quadrant handling, phi in (-pi, pi]; atan2(0,0)=0."""
    base = _atan_f32(y / jnp.where(x == 0.0, 1.0, x))
    return jnp.where(
        x > 0.0, base,
        jnp.where(x < 0.0, base + jnp.where(y >= 0.0, _PI, -_PI),
                  jnp.where(y > 0.0, _PI / 2.0,
                            jnp.where(y < 0.0, -_PI / 2.0, 0.0))))


def _argmax_ch(logits):
    """First-occurrence argmax over the (tiny) leading channel axis; no XLU, no iota."""
    c = logits.shape[0]
    best_val = logits[0]
    best_idx = jnp.zeros_like(logits[0])
    for k in range(1, c):
        better = logits[k] > best_val
        best_val = jnp.where(better, logits[k], best_val)
        best_idx = jnp.where(better, jnp.float32(k), best_idx)
    return best_idx


# ----------------------------------------------------------------------------- kernel
def _condnet_kernel(params_ref,
                    beta_ref, x_ref, istrack_ref, n_ref, layer_ref,
                    trackpt_ref, eta_ref, cos_ref, sin_ref,
                    cellcls_ref, trackcls_ref, pred_ref,
                    assigned_ref, cluster_ref, iscp_ref, class_ref,
                    pt_ref, etao_ref, phi_ref, pxpypz_ref):
    """init_cells + thresholds + find_condensation_points + create_particles + undo_scaling."""
    f32 = jnp.float32
    B, N = beta_ref.shape

    # SMEM scalars
    t_b = params_ref[0]
    t_d = params_ref[1]
    t_d2 = t_d * t_d
    tp_std, tp_mean = params_ref[2], params_ref[3]
    ppt_std, ppt_mean = params_ref[4], params_ref[5]
    eta_std, eta_mean = params_ref[6], params_ref[7]
    xh_std, xh_mean = params_ref[8], params_ref[9]
    yh_std, yh_mean = params_ref[10], params_ref[11]

    beta = beta_ref[...]                     # (B, N)
    x = x_ref[...]                           # (X_SIZE, B, N)
    istrack = istrack_ref[...]
    is_track1 = istrack == 1.0
    is_cell = istrack == 0.0
    lane_f = lax.broadcasted_iota(jnp.int32, (B, N), 1).astype(f32)   # node idx == arange(N)
    qualifying = (beta >= t_b) | is_track1                            # loop-invariant

    # -------- find_condensation_points: early-exit while loop, all state loop-carried
    def cond_fn(carry):
        _, _, _, _, n_prev, n_cur = carry
        return jnp.logical_not(jnp.logical_or(n_cur == 0, n_cur == n_prev))

    def body_fn(carry):
        i, assigned, cluster, iscp, _, n_cur = carry
        remove = 1.0 - assigned                       # pass_edge_info: 1 - src['assigned']
        betas = beta * remove
        score = betas * (1.0 + 999.0 * (istrack * remove))            # sort_beta score

        # per-graph argmax over nodes, first-max tie break (torch.max semantics)
        max_score = jnp.max(score, axis=-1, keepdims=True)            # (B, 1)
        first = jnp.min(jnp.where(score == max_score, lane_f, float(N)),
                        axis=-1, keepdims=True)                        # (B, 1)
        onehot_b = lane_f == first                                     # (B, N)
        onehot = onehot_b.astype(f32)

        max_beta = jnp.sum(betas * onehot, axis=-1, keepdims=True)     # (B, 1)
        max_x = jnp.sum(x * onehot[None, :, :], axis=-1, keepdims=True)  # (X_SIZE, B, 1)

        cond_points = onehot_b & ((max_beta >= t_b) | is_track1)
        new_track_cps = onehot_b & is_track1

        diff = max_x - x
        dist2 = jnp.sum(diff * diff, axis=0)                           # (B, N), no XLU
        newsel = (assigned == 0.0) & (dist2 <= t_d2) & (beta >= t_b) & is_cell
        newsel = newsel | new_track_cps

        iscp = jnp.where(cond_points, 1.0, iscp)
        cluster = jnp.where(newsel, i.astype(f32), cluster)
        assigned = jnp.where(newsel, 1.0, assigned)

        n_new = jnp.sum((qualifying & (assigned < 1.0)).astype(jnp.int32))
        return i + 1, assigned, cluster, iscp, n_cur, n_new

    zeros = jnp.zeros((B, N), f32)
    init = (jnp.int32(0), zeros, -jnp.ones((B, N), f32), zeros,
            jnp.int32(-2), jnp.int32(-1))                # sentinels cannot collide with counts
    _, assigned, cluster, iscp, _, _ = lax.while_loop(cond_fn, body_fn, init)

    assigned_ref[...] = assigned
    cluster_ref[...] = cluster

    # -------- create_particles (per-node) + undo_scaling
    nflag = n_ref[...]
    layer = layer_ref[...]
    track_pt = trackpt_ref[...]

    cell_arg = _argmax_ch(cellcls_ref[...])
    track_arg = _argmax_ch(trackcls_ref[...]) + 2.0
    pcls = jnp.where(is_track1, track_arg, cell_arg)

    mis_cell = is_cell & (pcls > 1.0)
    iscp = iscp * (1.0 - nflag) * (1.0 - mis_cell.astype(f32))
    iscp_ref[...] = iscp

    # low-pt track substitution of the regression output
    tpt = jnp.where(track_pt != 0.0, track_pt * tp_std + tp_mean, track_pt)
    tpt = jnp.where(track_pt != 0.0, jnp.exp(tpt), tpt) / 1000.0
    low_pt = is_track1 & (tpt < 15.0)                                   # (B, N)
    node_pred = jnp.stack([track_pt, eta_ref[...], cos_ref[...], sin_ref[...]], axis=0)
    pred = jnp.where(low_pt[None, :, :], node_pred, pred_ref[...])      # (4, B, N)

    # class relabeling
    mis_track = is_track1 & ((pcls == 0.0) | (pcls == 1.0))
    pcls = jnp.where(mis_track, 2.0, pcls)
    neutral0 = is_cell & (pcls == 1.0) & (layer == 0.0)
    pcls = jnp.where(neutral0, 0.0, pcls)
    class_ref[...] = pcls

    # undo_scaling (per node; meaningful where is-cond-point > 0)
    pt = jnp.exp(ppt_std * pred[0] + ppt_mean)
    eta_s = eta_std * pred[1] + eta_mean
    xhat = xh_std * pred[2] + xh_mean
    yhat = yh_std * pred[3] + yh_mean

    r2 = xhat * xhat + yhat * yhat
    nz = r2 > 0.0
    inv_r = lax.rsqrt(jnp.where(nz, r2, 1.0))            # EUP; guarded against r == 0
    px = jnp.where(nz, pt * xhat * inv_r, pt)            # pt*cos(atan2(y,x)); cos(0)=1 at r=0
    py = jnp.where(nz, pt * yhat * inv_r, 0.0)           # pt*sin(atan2(y,x)); sin(0)=0 at r=0
    pz = pt * 0.5 * (jnp.exp(eta_s) - jnp.exp(-eta_s))   # == pt / tan(2*atan(-exp(eta)))
    phi = _atan2_f32(yhat, xhat)

    pt_ref[...] = pt
    etao_ref[...] = eta_s
    phi_ref[...] = phi
    pxpypz_ref[...] = jnp.stack([px, py, pz], axis=0)    # (3, B, N)


# ----------------------------------------------------------------------------- wrappers
@jax.jit
def condnet_inference_device(params, beta, x, istrack, nflag, layer, track_pt,
                             eta, cos_phi, sin_phi, cell_cls, track_cls, pred):
    B, N = beta.shape
    assert B % SUB == 0, "batch of graphs must be a multiple of 8 (sublane axis)"
    f32 = jnp.float32

    def node():
        return pl.BlockSpec((SUB, N), lambda b, p: (b, 0))

    def chan(c):
        return pl.BlockSpec((c, SUB, N), lambda b, p: (0, b, 0))

    grid_spec = pltpu.PrefetchScalarGridSpec(
        num_scalar_prefetch=1,                  # params -> SMEM scalars
        grid=(B // SUB,),
        in_specs=[node(), chan(X_SIZE), node(), node(), node(), node(), node(),
                  node(), node(), chan(C_CELL), chan(C_TRACK), chan(4)],
        out_specs=(node(), node(), node(), node(), node(), node(), node(), chan(3)),
    )
    out_shapes = (
        jax.ShapeDtypeStruct((B, N), f32),       # assigned
        jax.ShapeDtypeStruct((B, N), f32),       # cluster idx
        jax.ShapeDtypeStruct((B, N), f32),       # is cond point
        jax.ShapeDtypeStruct((B, N), f32),       # particle class
        jax.ShapeDtypeStruct((B, N), f32),       # pt
        jax.ShapeDtypeStruct((B, N), f32),       # eta
        jax.ShapeDtypeStruct((B, N), f32),       # phi
        jax.ShapeDtypeStruct((3, B, N), f32),    # px, py, pz
    )
    return pl.pallas_call(
        _condnet_kernel,
        out_shape=out_shapes,
        grid_spec=grid_spec,
        compiler_params=pltpu.CompilerParams(dimension_semantics=("parallel",)),
    )(params, beta, x, istrack, nflag, layer, track_pt, eta, cos_phi, sin_phi,
      cell_cls, track_cls, pred)


def condnet_inference_forward(node_data, config):
    vt = config['var transform']
    params = jnp.asarray(
        [config['t_b'], config['t_d'],
         vt['track_pt']['std'], vt['track_pt']['mean'],
         vt['particle_pt']['std'], vt['particle_pt']['mean'],
         vt['particle_eta']['std'], vt['particle_eta']['mean'],
         vt['particle_xhat']['std'], vt['particle_xhat']['mean'],
         vt['particle_yhat']['std'], vt['particle_yhat']['mean']],
        dtype=jnp.float32)

    outs = condnet_inference_device(
        params, node_data['beta'], node_data['x'], node_data['isTrack'],
        node_data['n'], node_data['layer_cell'], node_data['track_pt'],
        node_data['eta'], node_data['cosin_phi'], node_data['sinu_phi'],
        node_data['cell class pred'], node_data['track class pred'],
        node_data['pt_eta_xhat_yhat_pred'])
    outs = jax.block_until_ready(outs)
    (_assigned, _cluster_idx, iscp, pcls, pt, eta_s, phi, pxpypz) = outs

    # variable-length boolean gather of condensation points (dynamic shape -> host side)
    iscp_np = np.asarray(iscp)                              # (B, N), values in {0, 1}
    mask = iscp_np > 0
    predicted_num_particles = iscp_np.sum(axis=1)           # dgl.sum_nodes: per-graph floats

    eta_p = np.asarray(eta_s)[mask]
    phi_p = np.asarray(phi)[mask]
    pt_p = np.asarray(pt)[mask]
    pxpypz_p = np.transpose(np.asarray(pxpypz), (1, 2, 0))[mask]      # (K, 3)
    cls_p = np.asarray(pcls)[mask].astype(np.int64)
    parent_p = np.asarray(node_data['parent target'])[mask]
    predicted_particles = (eta_p, phi_p, pt_p, pxpypz_p, cls_p, parent_p)
    return predicted_particles, predicted_num_particles


# ----------------------------------------------------------------------------- main
if __name__ == "__main__":
    key = jax.random.PRNGKey(0)
    ks = jax.random.split(key, 12)
    B, N = SUB, N_NODES          # 8 independent graphs on sublanes, 128 nodes each
    f32 = jnp.float32

    istrack = (jax.random.uniform(ks[0], (B, N)) < 0.2).astype(f32)
    angle = jax.random.uniform(ks[1], (B, N)) * 2.0 * np.pi
    # node idx is assumed to be arange(N) per graph (lane iota inside the kernel).
    node_data = {
        'beta': jax.random.uniform(ks[2], (B, N), dtype=f32),
        'x': jax.random.normal(ks[3], (X_SIZE, B, N), dtype=f32),
        'isTrack': istrack,
        'n': (jax.random.uniform(ks[4], (B, N)) < 0.1).astype(f32),
        'layer_cell': jnp.floor(jax.random.uniform(ks[5], (B, N)) * 4.0).astype(f32),
        'track_pt': istrack * jax.random.normal(ks[6], (B, N), dtype=f32),
        'eta': jax.random.normal(ks[7], (B, N), dtype=f32),
        'cosin_phi': jnp.cos(angle).astype(f32),
        'sinu_phi': jnp.sin(angle).astype(f32),
        'cell class pred': jax.random.normal(ks[8], (C_CELL, B, N), dtype=f32),
        'track class pred': jax.random.normal(ks[9], (C_TRACK, B, N), dtype=f32),
        'pt_eta_xhat_yhat_pred': jax.random.normal(ks[10], (4, B, N), dtype=f32),
        'parent target': jnp.floor(jax.random.uniform(ks[11], (B, N)) * 50.0).astype(f32),
    }

    particles, num_particles = condnet_inference_forward(node_data, CONFIG)
    eta_p, phi_p, pt_p, pxpypz_p, cls_p, parent_p = particles

    assert pxpypz_p.shape[1] == 3
    assert eta_p.shape == phi_p.shape == pt_p.shape == cls_p.shape == parent_p.shape
    assert num_particles.shape == (B,)
    assert abs(float(np.sum(num_particles)) - eta_p.shape[0]) < 1e-3
    assert np.all(np.isfinite(pxpypz_p)) and np.all(np.isfinite(phi_p))
    print("KERNEL_OK")
</pallas_src>

<mosaic_0001>
module attributes {stable_mosaic.version = 11 : i64} {
  func.func @_condnet_kernel(%arg0: i32, %arg1: memref<12xf32, #tpu.memory_space<smem>>, %arg2: memref<8x128xf32, #tpu.memory_space<vmem>>, %arg3: memref<3x8x128xf32, #tpu.memory_space<vmem>>, %arg4: memref<8x128xf32, #tpu.memory_space<vmem>>, %arg5: memref<8x128xf32, #tpu.memory_space<vmem>>, %arg6: memref<8x128xf32, #tpu.memory_space<vmem>>, %arg7: memref<8x128xf32, #tpu.memory_space<vmem>>, %arg8: memref<8x128xf32, #tpu.memory_space<vmem>>, %arg9: memref<8x128xf32, #tpu.memory_space<vmem>>, %arg10: memref<8x128xf32, #tpu.memory_space<vmem>>, %arg11: memref<4x8x128xf32, #tpu.memory_space<vmem>>, %arg12: memref<3x8x128xf32, #tpu.memory_space<vmem>>, %arg13: memref<4x8x128xf32, #tpu.memory_space<vmem>>, %arg14: memref<8x128xf32, #tpu.memory_space<vmem>>, %arg15: memref<8x128xf32, #tpu.memory_space<vmem>>, %arg16: memref<8x128xf32, #tpu.memory_space<vmem>>, %arg17: memref<8x128xf32, #tpu.memory_space<vmem>>, %arg18: memref<8x128xf32, #tpu.memory_space<vmem>>, %arg19: memref<8x128xf32, #tpu.memory_space<vmem>>, %arg20: memref<8x128xf32, #tpu.memory_space<vmem>>, %arg21: memref<3x8x128xf32, #tpu.memory_space<vmem>>) attributes {dimension_semantics = [#tpu.dimension_semantics<parallel>], iteration_bounds = array<i64: 1>, scalar_prefetch = 1 : i64, scratch_operands = 0 : i64, tpu.core_type = #tpu.core_type<tc>, window_params = [{transform_indices = @transform_0, window_bounds = array<i64: 8, 128>}, {transform_indices = @transform_1, window_bounds = array<i64: 3, 8, 128>}, {transform_indices = @transform_2, window_bounds = array<i64: 8, 128>}, {transform_indices = @transform_3, window_bounds = array<i64: 8, 128>}, {transform_indices = @transform_4, window_bounds = array<i64: 8, 128>}, {transform_indices = @transform_5, window_bounds = array<i64: 8, 128>}, {transform_indices = @transform_6, window_bounds = array<i64: 8, 128>}, {transform_indices = @transform_7, window_bounds = array<i64: 8, 128>}, {transform_indices = @transform_8, window_bounds = array<i64: 8, 128>}, {transform_indices = @transform_9, window_bounds = array<i64: 4, 8, 128>}, {transform_indices = @transform_10, window_bounds = array<i64: 3, 8, 128>}, {transform_indices = @transform_11, window_bounds = array<i64: 4, 8, 128>}, {transform_indices = @transform_12, window_bounds = array<i64: 8, 128>}, {transform_indices = @transform_13, window_bounds = array<i64: 8, 128>}, {transform_indices = @transform_14, window_bounds = array<i64: 8, 128>}, {transform_indices = @transform_15, window_bounds = array<i64: 8, 128>}, {transform_indices = @transform_16, window_bounds = array<i64: 8, 128>}, {transform_indices = @transform_17, window_bounds = array<i64: 8, 128>}, {transform_indices = @transform_18, window_bounds = array<i64: 8, 128>}, {transform_indices = @transform_19, window_bounds = array<i64: 3, 8, 128>}]} {
    %c0 = arith.constant 0 : index
    %0 = memref.load %arg1[%c0] : memref<12xf32, #tpu.memory_space<smem>>
    %c1 = arith.constant 1 : index
    %1 = memref.load %arg1[%c1] : memref<12xf32, #tpu.memory_space<smem>>
    %2 = arith.mulf %1, %1 : f32
    %c2 = arith.constant 2 : index
    %3 = memref.load %arg1[%c2] : memref<12xf32, #tpu.memory_space<smem>>
    %c3 = arith.constant 3 : index
    %4 = memref.load %arg1[%c3] : memref<12xf32, #tpu.memory_space<smem>>
    %c4 = arith.constant 4 : index
    %5 = memref.load %arg1[%c4] : memref<12xf32, #tpu.memory_space<smem>>
    %c5 = arith.constant 5 : index
    %6 = memref.load %arg1[%c5] : memref<12xf32, #tpu.memory_space<smem>>
    %c6 = arith.constant 6 : index
    %7 = memref.load %arg1[%c6] : memref<12xf32, #tpu.memory_space<smem>>
    %c7 = arith.constant 7 : index
    %8 = memref.load %arg1[%c7] : memref<12xf32, #tpu.memory_space<smem>>
    %c8 = arith.constant 8 : index
    %9 = memref.load %arg1[%c8] : memref<12xf32, #tpu.memory_space<smem>>
    %c9 = arith.constant 9 : index
    %10 = memref.load %arg1[%c9] : memref<12xf32, #tpu.memory_space<smem>>
    %c10 = arith.constant 10 : index
    %11 = memref.load %arg1[%c10] : memref<12xf32, #tpu.memory_space<smem>>
    %c11 = arith.constant 11 : index
    %12 = memref.load %arg1[%c11] : memref<12xf32, #tpu.memory_space<smem>>
    %c0_0 = arith.constant 0 : index
    %c0_1 = arith.constant 0 : index
    %13 = vector.load %arg2[%c0_0, %c0_1] : memref<8x128xf32, #tpu.memory_space<vmem>>, vector<8x128xf32>
    %c0_2 = arith.constant 0 : index
    %c0_3 = arith.constant 0 : index
    %c0_4 = arith.constant 0 : index
    %14 = vector.load %arg3[%c0_2, %c0_3, %c0_4] : memref<3x8x128xf32, #tpu.memory_space<vmem>>, vector<3x8x128xf32>
    %c0_5 = arith.constant 0 : index
    %c0_6 = arith.constant 0 : index
    %15 = vector.load %arg4[%c0_5, %c0_6] : memref<8x128xf32, #tpu.memory_space<vmem>>, vector<8x128xf32>
    %cst = arith.constant 1.000000e+00 : f32
    %16 = vector.broadcast %cst : f32 to vector<8x128xf32>
    %17 = arith.cmpf oeq, %15, %16 : vector<8x128xf32>
    %cst_7 = arith.constant 0.000000e+00 : f32
    %18 = vector.broadcast %cst_7 : f32 to vector<8x128xf32>
    %19 = arith.cmpf oeq, %15, %18 : vector<8x128xf32>
    %20 = tpu.iota {dimensions = array<i32: 1>} : vector<8x128xi32>
    %21 = arith.sitofp %20 : vector<8x128xi32> to vector<8x128xf32>
    %22 = vector.broadcast %0 : f32 to vector<8x128xf32>
    %23 = arith.cmpf oge, %13, %22 : vector<8x128xf32>
    %24 = arith.ori %23, %17 : vector<8x128xi1>
    %cst_8 = arith.constant 0.000000e+00 : f32
    %25 = vector.broadcast %cst_8 : f32 to vector<8x128xf32>
    %cst_9 = arith.constant 1.000000e+00 : f32
    %26 = vector.broadcast %cst_9 : f32 to vector<8x128xf32>
    %cst_10 = arith.constant 0.000000e+00 : f32
    %27 = vector.broadcast %cst_10 : f32 to vector<8x128xf32>
    %28 = arith.subf %27, %26 : vector<8x128xf32>
    %c0_i32 = arith.constant 0 : i32
    %c-2_i32 = arith.constant -2 : i32
    %c-1_i32 = arith.constant -1 : i32
    %29:6 = scf.while (%arg22 = %c0_i32, %arg23 = %25, %arg24 = %28, %arg25 = %25, %arg26 = %c-2_i32, %arg27 = %c-1_i32) : (i32, vector<8x128xf32>, vector<8x128xf32>, vector<8x128xf32>, i32, i32) -> (i32, vector<8x128xf32>, vector<8x128xf32>, vector<8x128xf32>, i32, i32) {
      %c0_i32_102 = arith.constant 0 : i32
      %261 = arith.cmpi eq, %arg27, %c0_i32_102 : i32
      %262 = arith.cmpi eq, %arg27, %arg26 : i32
      %263 = arith.ori %261, %262 : i1
      %true = arith.constant true
      %264 = arith.xori %263, %true : i1
      scf.condition(%264) %arg22, %arg23, %arg24, %arg25, %arg26, %arg27 : i32, vector<8x128xf32>, vector<8x128xf32>, vector<8x128xf32>, i32, i32
    } do {
    ^bb0(%arg22: i32, %arg23: vector<8x128xf32>, %arg24: vector<8x128xf32>, %arg25: vector<8x128xf32>, %arg26: i32, %arg27: i32):
      %cst_102 = arith.constant 1.000000e+00 : f32
      %261 = vector.broadcast %cst_102 : f32 to vector<8x128xf32>
      %262 = arith.subf %261, %arg23 : vector<8x128xf32>
      %263 = arith.mulf %13, %262 : vector<8x128xf32>
      %264 = arith.mulf %15, %262 : vector<8x128xf32>
      %cst_103 = arith.constant 9.990000e+02 : f32
      %265 = vector.broadcast %cst_103 : f32 to vector<8x128xf32>
      %266 = arith.mulf %265, %264 : vector<8x128xf32>
      %cst_104 = arith.constant 1.000000e+00 : f32
      %267 = vector.broadcast %cst_104 : f32 to vector<8x128xf32>
      %268 = arith.addf %267, %266 : vector<8x128xf32>
      %269 = arith.mulf %263, %268 : vector<8x128xf32>
      %cst_105 = arith.constant dense<0xFF800000> : vector<8xf32>
      %270 = vector.multi_reduction <maximumf>, %269, %cst_105 [1] : vector<8x128xf32> to vector<8xf32>
      %271 = vector.shape_cast %270 : vector<8xf32> to vector<8x1xf32>
      %272 = vector.broadcast %271 : vector<8x1xf32> to vector<8x128xf32>
      %273 = arith.cmpf oeq, %269, %272 : vector<8x128xf32>
      %cst_106 = arith.constant 1.280000e+02 : f32
      %274 = vector.broadcast %cst_106 : f32 to vector<8x128xf32>
      %275 = arith.select %273, %21, %274 : vector<8x128xi1>, vector<8x128xf32>
      %cst_107 = arith.constant dense<0x7F800000> : vector<8xf32>
      %276 = vector.multi_reduction <minimumf>, %275, %cst_107 [1] : vector<8x128xf32> to vector<8xf32>
      %277 = vector.shape_cast %276 : vector<8xf32> to vector<8x1xf32>
      %278 = vector.broadcast %277 : vector<8x1xf32> to vector<8x128xf32>
      %279 = arith.cmpf oeq, %21, %278 : vector<8x128xf32>
      %280 = arith.extui %279 : vector<8x128xi1> to vector<8x128xi32>
      %281 = arith.sitofp %280 : vector<8x128xi32> to vector<8x128xf32>
      %282 = arith.mulf %263, %281 : vector<8x128xf32>
      %cst_108 = arith.constant dense<0.000000e+00> : vector<8xf32>
      %283 = vector.multi_reduction <add>, %282, %cst_108 [1] : vector<8x128xf32> to vector<8xf32>
      %284 = vector.shape_cast %283 : vector<8xf32> to vector<8x1xf32>
      %285 = vector.shape_cast %281 : vector<8x128xf32> to vector<1x8x128xf32>
      %286 = vector.broadcast %285 : vector<1x8x128xf32> to vector<3x8x128xf32>
      %287 = arith.mulf %14, %286 : vector<3x8x128xf32>
      %cst_109 = arith.constant dense<0.000000e+00> : vector<3x8xf32>
      %288 = vector.multi_reduction <add>, %287, %cst_109 [2] : vector<3x8x128xf32> to vector<3x8xf32>
      %289 = vector.shape_cast %288 : vector<3x8xf32> to vector<3x8x1xf32>
      %290 = vector.broadcast %0 : f32 to vector<8x1xf32>
      %291 = arith.cmpf oge, %284, %290 : vector<8x1xf32>
      %292 = vector.broadcast %291 : vector<8x1xi1> to vector<8x128xi1>
      %293 = arith.ori %292, %17 : vector<8x128xi1>
      %294 = arith.andi %279, %293 : vector<8x128xi1>
      %295 = arith.andi %279, %17 : vector<8x128xi1>
      %296 = vector.broadcast %289 : vector<3x8x1xf32> to vector<3x8x128xf32>
      %297 = arith.subf %296, %14 : vector<3x8x128xf32>
      %298 = arith.mulf %297, %297 : vector<3x8x128xf32>
      %cst_110 = arith.constant dense<0.000000e+00> : vector<8x128xf32>
      %299 = vector.multi_reduction <add>, %298, %cst_110 [0] : vector<3x8x128xf32> to vector<8x128xf32>
      %cst_111 = arith.constant 0.000000e+00 : f32
      %300 = vector.broadcast %cst_111 : f32 to vector<8x128xf32>
      %301 = arith.cmpf oeq, %arg23, %300 : vector<8x128xf32>
      %302 = vector.broadcast %2 : f32 to vector<8x128xf32>
      %303 = arith.cmpf ole, %299, %302 : vector<8x128xf32>
      %304 = arith.andi %301, %303 : vector<8x128xi1>
      %305 = vector.broadcast %0 : f32 to vector<8x128xf32>
      %306 = arith.cmpf oge, %13, %305 : vector<8x128xf32>
      %307 = arith.andi %304, %306 : vector<8x128xi1>
      %308 = arith.andi %307, %19 : vector<8x128xi1>
      %309 = arith.ori %308, %295 : vector<8x128xi1>
      %cst_112 = arith.constant 1.000000e+00 : f32
      %310 = vector.broadcast %cst_112 : f32 to vector<8x128xf32>
      %311 = arith.select %294, %310, %arg25 : vector<8x128xi1>, vector<8x128xf32>
      %312 = arith.sitofp %arg22 : i32 to f32
      %313 = vector.broadcast %312 : f32 to vector<8x128xf32>
      %314 = arith.select %309, %313, %arg24 : vector<8x128xi1>, vector<8x128xf32>
      %cst_113 = arith.constant 1.000000e+00 : f32
      %315 = vector.broadcast %cst_113 : f32 to vector<8x128xf32>
      %316 = arith.select %309, %315, %arg23 : vector<8x128xi1>, vector<8x128xf32>
      %cst_114 = arith.constant 1.000000e+00 : f32
      %317 = vector.broadcast %cst_114 : f32 to vector<8x128xf32>
      %318 = arith.cmpf olt, %316, %317 : vector<8x128xf32>
      %319 = arith.andi %24, %318 : vector<8x128xi1>
      %320 = arith.extui %319 : vector<8x128xi1> to vector<8x128xi32>
      %321 = vector.shape_cast %320 : vector<8x128xi32> to vector<1x8x128xi32>
      %cst_115 = arith.constant dense<0> : vector<1xi32>
      %322 = vector.multi_reduction <add>, %321, %cst_115 [1, 2] : vector<1x8x128xi32> to vector<1xi32>
      %323 = vector.shape_cast %322 : vector<1xi32> to vector<1x1x1xi32>
      %324 = vector.extract %323[0, 0, 0] : i32 from vector<1x1x1xi32>
      %c1_i32 = arith.constant 1 : i32
      %325 = arith.addi %arg22, %c1_i32 : i32
      scf.yield %325, %316, %314, %311, %arg27, %324 : i32, vector<8x128xf32>, vector<8x128xf32>, vector<8x128xf32>, i32, i32
    }
    %c0_11 = arith.constant 0 : index
    %c0_12 = arith.constant 0 : index
    %30 = vector.load %arg14[%c0_11, %c0_12] : memref<8x128xf32, #tpu.memory_space<vmem>>, vector<8x128xf32>
    tpu.vector_store %arg14[%c0_11, %c0_12], %29#1 {strides = array<i32>} : memref<8x128xf32, #tpu.memory_space<vmem>>, vector<8x128xf32>,
    %c0_13 = arith.constant 0 : index
    %c0_14 = arith.constant 0 : index
    %31 = vector.load %arg15[%c0_13, %c0_14] : memref<8x128xf32, #tpu.memory_space<vmem>>, vector<8x128xf32>
    tpu.vector_store %arg15[%c0_13, %c0_14], %29#2 {strides = array<i32>} : memref<8x128xf32, #tpu.memory_space<vmem>>, vector<8x128xf32>,
    %c0_15 = arith.constant 0 : index
    %c0_16 = arith.constant 0 : index
    %32 = vector.load %arg5[%c0_15, %c0_16] : memref<8x128xf32, #tpu.memory_space<vmem>>, vector<8x128xf32>
    %c0_17 = arith.constant 0 : index
    %c0_18 = arith.constant 0 : index
    %33 = vector.load %arg6[%c0_17, %c0_18] : memref<8x128xf32, #tpu.memory_space<vmem>>, vector<8x128xf32>
    %c0_19 = arith.constant 0 : index
    %c0_20 = arith.constant 0 : index
    %34 = vector.load %arg7[%c0_19, %c0_20] : memref<8x128xf32, #tpu.memory_space<vmem>>, vector<8x128xf32>
    %c0_21 = arith.constant 0 : index
    %c0_22 = arith.constant 0 : index
    %c0_23 = arith.constant 0 : index
    %35 = vector.load %arg11[%c0_21, %c0_22, %c0_23] : memref<4x8x128xf32, #tpu.memory_space<vmem>>, vector<4x8x128xf32>
    %36 = vector.extract_strided_slice %35 {offsets = [0, 0, 0], sizes = [1, 8, 128], strides = [1, 1, 1]} : vector<4x8x128xf32> to vector<1x8x128xf32>
    %37 = vector.shape_cast %36 : vector<1x8x128xf32> to vector<8x128xf32>
    %cst_24 = arith.constant 0.000000e+00 : f32
    %38 = vector.broadcast %cst_24 : f32 to vector<8x128xf32>
    %39 = vector.extract_strided_slice %35 {offsets = [1, 0, 0], sizes = [1, 8, 128], strides = [1, 1, 1]} : vector<4x8x128xf32> to vector<1x8x128xf32>
    %40 = vector.shape_cast %39 : vector<1x8x128xf32> to vector<8x128xf32>
    %41 = arith.cmpf ogt, %40, %37 : vector<8x128xf32>
    %42 = vector.extract_strided_slice %35 {offsets = [1, 0, 0], sizes = [1, 8, 128], strides = [1, 1, 1]} : vector<4x8x128xf32> to vector<1x8x128xf32>
    %43 = vector.shape_cast %42 : vector<1x8x128xf32> to vector<8x128xf32>
    %44 = arith.select %41, %43, %37 : vector<8x128xi1>, vector<8x128xf32>
    %cst_25 = arith.constant 1.000000e+00 : f32
    %45 = vector.broadcast %cst_25 : f32 to vector<8x128xf32>
    %46 = arith.select %41, %45, %38 : vector<8x128xi1>, vector<8x128xf32>
    %47 = vector.extract_strided_slice %35 {offsets = [2, 0, 0], sizes = [1, 8, 128], strides = [1, 1, 1]} : vector<4x8x128xf32> to vector<1x8x128xf32>
    %48 = vector.shape_cast %47 : vector<1x8x128xf32> to vector<8x128xf32>
    %49 = arith.cmpf ogt, %48, %44 : vector<8x128xf32>
    %50 = vector.extract_strided_slice %35 {offsets = [2, 0, 0], sizes = [1, 8, 128], strides = [1, 1, 1]} : vector<4x8x128xf32> to vector<1x8x128xf32>
    %51 = vector.shape_cast %50 : vector<1x8x128xf32> to vector<8x128xf32>
    %52 = arith.select %49, %51, %44 : vector<8x128xi1>, vector<8x128xf32>
    %cst_26 = arith.constant 2.000000e+00 : f32
    %53 = vector.broadcast %cst_26 : f32 to vector<8x128xf32>
    %54 = arith.select %49, %53, %46 : vector<8x128xi1>, vector<8x128xf32>
    %55 = vector.extract_strided_slice %35 {offsets = [3, 0, 0], sizes = [1, 8, 128], strides = [1, 1, 1]} : vector<4x8x128xf32> to vector<1x8x128xf32>
    %56 = vector.shape_cast %55 : vector<1x8x128xf32> to vector<8x128xf32>
    %57 = arith.cmpf ogt, %56, %52 : vector<8x128xf32>
    %cst_27 = arith.constant 3.000000e+00 : f32
    %58 = vector.broadcast %cst_27 : f32 to vector<8x128xf32>
    %59 = arith.select %57, %58, %54 : vector<8x128xi1>, vector<8x128xf32>
    %c0_28 = arith.constant 0 : index
    %c0_29 = arith.constant 0 : index
    %c0_30 = arith.constant 0 : index
    %60 = vector.load %arg12[%c0_28, %c0_29, %c0_30] : memref<3x8x128xf32, #tpu.memory_space<vmem>>, vector<3x8x128xf32>
    %61 = vector.extract_strided_slice %60 {offsets = [0, 0, 0], sizes = [1, 8, 128], strides = [1, 1, 1]} : vector<3x8x128xf32> to vector<1x8x128xf32>
    %62 = vector.shape_cast %61 : vector<1x8x128xf32> to vector<8x128xf32>
    %cst_31 = arith.constant 0.000000e+00 : f32
    %63 = vector.broadcast %cst_31 : f32 to vector<8x128xf32>
    %64 = vector.extract_strided_slice %60 {offsets = [1, 0, 0], sizes = [1, 8, 128], strides = [1, 1, 1]} : vector<3x8x128xf32> to vector<1x8x128xf32>
    %65 = vector.shape_cast %64 : vector<1x8x128xf32> to vector<8x128xf32>
    %66 = arith.cmpf ogt, %65, %62 : vector<8x128xf32>
    %67 = vector.extract_strided_slice %60 {offsets = [1, 0, 0], sizes = [1, 8, 128], strides = [1, 1, 1]} : vector<3x8x128xf32> to vector<1x8x128xf32>
    %68 = vector.shape_cast %67 : vector<1x8x128xf32> to vector<8x128xf32>
    %69 = arith.select %66, %68, %62 : vector<8x128xi1>, vector<8x128xf32>
    %cst_32 = arith.constant 1.000000e+00 : f32
    %70 = vector.broadcast %cst_32 : f32 to vector<8x128xf32>
    %71 = arith.select %66, %70, %63 : vector<8x128xi1>, vector<8x128xf32>
    %72 = vector.extract_strided_slice %60 {offsets = [2, 0, 0], sizes = [1, 8, 128], strides = [1, 1, 1]} : vector<3x8x128xf32> to vector<1x8x128xf32>
    %73 = vector.shape_cast %72 : vector<1x8x128xf32> to vector<8x128xf32>
    %74 = arith.cmpf ogt, %73, %69 : vector<8x128xf32>
    %cst_33 = arith.constant 2.000000e+00 : f32
    %75 = vector.broadcast %cst_33 : f32 to vector<8x128xf32>
    %76 = arith.select %74, %75, %71 : vector<8x128xi1>, vector<8x128xf32>
    %cst_34 = arith.constant 2.000000e+00 : f32
    %77 = vector.broadcast %cst_34 : f32 to vector<8x128xf32>
    %78 = arith.addf %76, %77 : vector<8x128xf32>
    %79 = arith.select %17, %78, %59 : vector<8x128xi1>, vector<8x128xf32>
    %cst_35 = arith.constant 1.000000e+00 : f32
    %80 = vector.broadcast %cst_35 : f32 to vector<8x128xf32>
    %81 = arith.cmpf ogt, %79, %80 : vector<8x128xf32>
    %82 = arith.andi %19, %81 : vector<8x128xi1>
    %cst_36 = arith.constant 1.000000e+00 : f32
    %83 = vector.broadcast %cst_36 : f32 to vector<8x128xf32>
    %84 = arith.subf %83, %32 : vector<8x128xf32>
    %85 = arith.mulf %29#3, %84 : vector<8x128xf32>
    %86 = arith.extui %82 : vector<8x128xi1> to vector<8x128xi32>
    %87 = arith.sitofp %86 : vector<8x128xi32> to vector<8x128xf32>
    %cst_37 = arith.constant 1.000000e+00 : f32
    %88 = vector.broadcast %cst_37 : f32 to vector<8x128xf32>
    %89 = arith.subf %88, %87 : vector<8x128xf32>
    %90 = arith.mulf %85, %89 : vector<8x128xf32>
    %c0_38 = arith.constant 0 : index
    %c0_39 = arith.constant 0 : index
    %91 = vector.load %arg16[%c0_38, %c0_39] : memref<8x128xf32, #tpu.memory_space<vmem>>, vector<8x128xf32>
    tpu.vector_store %arg16[%c0_38, %c0_39], %90 {strides = array<i32>} : memref<8x128xf32, #tpu.memory_space<vmem>>, vector<8x128xf32>,
    %cst_40 = arith.constant 0.000000e+00 : f32
    %92 = vector.broadcast %cst_40 : f32 to vector<8x128xf32>
    %93 = arith.cmpf one, %34, %92 : vector<8x128xf32>
    %94 = vector.broadcast %3 : f32 to vector<8x128xf32>
    %95 = arith.mulf %34, %94 : vector<8x128xf32>
    %96 = vector.broadcast %4 : f32 to vector<8x128xf32>
    %97 = arith.addf %95, %96 : vector<8x128xf32>
    %98 = arith.select %93, %97, %34 : vector<8x128xi1>, vector<8x128xf32>
    %cst_41 = arith.constant 0.000000e+00 : f32
    %99 = vector.broadcast %cst_41 : f32 to vector<8x128xf32>
    %100 = arith.cmpf one, %34, %99 : vector<8x128xf32>
    %101 = math.exp %98 : vector<8x128xf32>
    %102 = arith.select %100, %101, %98 : vector<8x128xi1>, vector<8x128xf32>
    %cst_42 = arith.constant 1.000000e+03 : f32
    %103 = vector.broadcast %cst_42 : f32 to vector<8x128xf32>
    %104 = arith.divf %102, %103 : vector<8x128xf32>
    %cst_43 = arith.constant 1.500000e+01 : f32
    %105 = vector.broadcast %cst_43 : f32 to vector<8x128xf32>
    %106 = arith.cmpf olt, %104, %105 : vector<8x128xf32>
    %107 = arith.andi %17, %106 : vector<8x128xi1>
    %c0_44 = arith.constant 0 : index
    %c0_45 = arith.constant 0 : index
    %108 = vector.load %arg8[%c0_44, %c0_45] : memref<8x128xf32, #tpu.memory_space<vmem>>, vector<8x128xf32>
    %c0_46 = arith.constant 0 : index
    %c0_47 = arith.constant 0 : index
    %109 = vector.load %arg9[%c0_46, %c0_47] : memref<8x128xf32, #tpu.memory_space<vmem>>, vector<8x128xf32>
    %c0_48 = arith.constant 0 : index
    %c0_49 = arith.constant 0 : index
    %110 = vector.load %arg10[%c0_48, %c0_49] : memref<8x128xf32, #tpu.memory_space<vmem>>, vector<8x128xf32>
    %111 = vector.shape_cast %34 : vector<8x128xf32> to vector<1x8x128xf32>
    %112 = vector.shape_cast %108 : vector<8x128xf32> to vector<1x8x128xf32>
    %113 = vector.shape_cast %109 : vector<8x128xf32> to vector<1x8x128xf32>
    %114 = vector.shape_cast %110 : vector<8x128xf32> to vector<1x8x128xf32>
    %115 = tpu.concatenate %111, %112, %113, %114 in 0 : vector<1x8x128xf32>, vector<1x8x128xf32>, vector<1x8x128xf32>, vector<1x8x128xf32> -> vector<4x8x128xf32>
    %116 = vector.shape_cast %107 : vector<8x128xi1> to vector<1x8x128xi1>
    %c0_50 = arith.constant 0 : index
    %c0_51 = arith.constant 0 : index
    %c0_52 = arith.constant 0 : index
    %117 = vector.load %arg13[%c0_50, %c0_51, %c0_52] : memref<4x8x128xf32, #tpu.memory_space<vmem>>, vector<4x8x128xf32>
    %118 = vector.shape_cast %116 : vector<1x8x128xi1> to vector<1x8x128xi1>
    %119 = vector.broadcast %118 : vector<1x8x128xi1> to vector<4x8x128xi1>
    %120 = arith.select %119, %115, %117 : vector<4x8x128xi1>, vector<4x8x128xf32>
    %cst_53 = arith.constant 0.000000e+00 : f32
    %121 = vector.broadcast %cst_53 : f32 to vector<8x128xf32>
    %122 = arith.cmpf oeq, %79, %121 : vector<8x128xf32>
    %cst_54 = arith.constant 1.000000e+00 : f32
    %123 = vector.broadcast %cst_54 : f32 to vector<8x128xf32>
    %124 = arith.cmpf oeq, %79, %123 : vector<8x128xf32>
    %125 = arith.ori %122, %124 : vector<8x128xi1>
    %126 = arith.andi %17, %125 : vector<8x128xi1>
    %cst_55 = arith.constant 2.000000e+00 : f32
    %127 = vector.broadcast %cst_55 : f32 to vector<8x128xf32>
    %128 = arith.select %126, %127, %79 : vector<8x128xi1>, vector<8x128xf32>
    %cst_56 = arith.constant 1.000000e+00 : f32
    %129 = vector.broadcast %cst_56 : f32 to vector<8x128xf32>
    %130 = arith.cmpf oeq, %128, %129 : vector<8x128xf32>
    %131 = arith.andi %19, %130 : vector<8x128xi1>
    %cst_57 = arith.constant 0.000000e+00 : f32
    %132 = vector.broadcast %cst_57 : f32 to vector<8x128xf32>
    %133 = arith.cmpf oeq, %33, %132 : vector<8x128xf32>
    %134 = arith.andi %131, %133 : vector<8x128xi1>
    %cst_58 = arith.constant 0.000000e+00 : f32
    %135 = vector.broadcast %cst_58 : f32 to vector<8x128xf32>
    %136 = arith.select %134, %135, %128 : vector<8x128xi1>, vector<8x128xf32>
    %c0_59 = arith.constant 0 : index
    %c0_60 = arith.constant 0 : index
    %137 = vector.load %arg17[%c0_59, %c0_60] : memref<8x128xf32, #tpu.memory_space<vmem>>, vector<8x128xf32>
    tpu.vector_store %arg17[%c0_59, %c0_60], %136 {strides = array<i32>} : memref<8x128xf32, #tpu.memory_space<vmem>>, vector<8x128xf32>,
    %138 = vector.extract_strided_slice %120 {offsets = [0, 0, 0], sizes = [1, 8, 128], strides = [1, 1, 1]} : vector<4x8x128xf32> to vector<1x8x128xf32>
    %139 = vector.shape_cast %138 : vector<1x8x128xf32> to vector<8x128xf32>
    %140 = vector.broadcast %5 : f32 to vector<8x128xf32>
    %141 = arith.mulf %140, %139 : vector<8x128xf32>
    %142 = vector.broadcast %6 : f32 to vector<8x128xf32>
    %143 = arith.addf %141, %142 : vector<8x128xf32>
    %144 = math.exp %143 : vector<8x128xf32>
    %145 = vector.extract_strided_slice %120 {offsets = [1, 0, 0], sizes = [1, 8, 128], strides = [1, 1, 1]} : vector<4x8x128xf32> to vector<1x8x128xf32>
    %146 = vector.shape_cast %145 : vector<1x8x128xf32> to vector<8x128xf32>
    %147 = vector.broadcast %7 : f32 to vector<8x128xf32>
    %148 = arith.mulf %147, %146 : vector<8x128xf32>
    %149 = vector.broadcast %8 : f32 to vector<8x128xf32>
    %150 = arith.addf %148, %149 : vector<8x128xf32>
    %151 = vector.extract_strided_slice %120 {offsets = [2, 0, 0], sizes = [1, 8, 128], strides = [1, 1, 1]} : vector<4x8x128xf32> to vector<1x8x128xf32>
    %152 = vector.shape_cast %151 : vector<1x8x128xf32> to vector<8x128xf32>
    %153 = vector.broadcast %9 : f32 to vector<8x128xf32>
    %154 = arith.mulf %153, %152 : vector<8x128xf32>
    %155 = vector.broadcast %10 : f32 to vector<8x128xf32>
    %156 = arith.addf %154, %155 : vector<8x128xf32>
    %157 = vector.extract_strided_slice %120 {offsets = [3, 0, 0], sizes = [1, 8, 128], strides = [1, 1, 1]} : vector<4x8x128xf32> to vector<1x8x128xf32>
    %158 = vector.shape_cast %157 : vector<1x8x128xf32> to vector<8x128xf32>
    %159 = vector.broadcast %11 : f32 to vector<8x128xf32>
    %160 = arith.mulf %159, %158 : vector<8x128xf32>
    %161 = vector.broadcast %12 : f32 to vector<8x128xf32>
    %162 = arith.addf %160, %161 : vector<8x128xf32>
    %163 = arith.mulf %156, %156 : vector<8x128xf32>
    %164 = arith.mulf %162, %162 : vector<8x128xf32>
    %165 = arith.addf %163, %164 : vector<8x128xf32>
    %cst_61 = arith.constant 0.000000e+00 : f32
    %166 = vector.broadcast %cst_61 : f32 to vector<8x128xf32>
    %167 = arith.cmpf ogt, %165, %166 : vector<8x128xf32>
    %cst_62 = arith.constant 1.000000e+00 : f32
    %168 = vector.broadcast %cst_62 : f32 to vector<8x128xf32>
    %169 = arith.select %167, %165, %168 : vector<8x128xi1>, vector<8x128xf32>
    %170 = math.rsqrt %169 : vector<8x128xf32>
    %171 = arith.mulf %144, %156 : vector<8x128xf32>
    %172 = arith.mulf %171, %170 : vector<8x128xf32>
    %173 = arith.select %167, %172, %144 : vector<8x128xi1>, vector<8x128xf32>
    %174 = arith.mulf %144, %162 : vector<8x128xf32>
    %175 = arith.mulf %174, %170 : vector<8x128xf32>
    %cst_63 = arith.constant 0.000000e+00 : f32
    %176 = vector.broadcast %cst_63 : f32 to vector<8x128xf32>
    %177 = arith.select %167, %175, %176 : vector<8x128xi1>, vector<8x128xf32>
    %cst_64 = arith.constant 5.000000e-01 : f32
    %178 = vector.broadcast %cst_64 : f32 to vector<8x128xf32>
    %179 = arith.mulf %144, %178 : vector<8x128xf32>
    %180 = math.exp %150 : vector<8x128xf32>
    %cst_65 = arith.constant 0.000000e+00 : f32
    %181 = vector.broadcast %cst_65 : f32 to vector<8x128xf32>
    %182 = arith.subf %181, %150 : vector<8x128xf32>
    %183 = math.exp %182 : vector<8x128xf32>
    %184 = arith.subf %180, %183 : vector<8x128xf32>
    %185 = arith.mulf %179, %184 : vector<8x128xf32>
    %cst_66 = arith.constant 0.000000e+00 : f32
    %186 = vector.broadcast %cst_66 : f32 to vector<8x128xf32>
    %187 = arith.cmpf oeq, %156, %186 : vector<8x128xf32>
    %cst_67 = arith.constant 1.000000e+00 : f32
    %188 = vector.broadcast %cst_67 : f32 to vector<8x128xf32>
    %189 = arith.select %187, %188, %156 : vector<8x128xi1>, vector<8x128xf32>
    %190 = arith.divf %162, %189 : vector<8x128xf32>
    %191 = math.absf %190 : vector<8x128xf32>
    %cst_68 = arith.constant 2.41421366 : f32
    %192 = vector.broadcast %cst_68 : f32 to vector<8x128xf32>
    %193 = arith.cmpf ogt, %191, %192 : vector<8x128xf32>
    %cst_69 = arith.constant 0.414213568 : f32
    %194 = vector.broadcast %cst_69 : f32 to vector<8x128xf32>
    %195 = arith.cmpf ogt, %191, %194 : vector<8x128xf32>
    %cst_70 = arith.constant 1.000000e-30 : f32
    %196 = vector.broadcast %cst_70 : f32 to vector<8x128xf32>
    %197 = arith.maximumf %191, %196 : vector<8x128xf32>
    %cst_71 = arith.constant -1.000000e+00 : f32
    %198 = vector.broadcast %cst_71 : f32 to vector<8x128xf32>
    %199 = arith.divf %198, %197 : vector<8x128xf32>
    %cst_72 = arith.constant 1.000000e+00 : f32
    %200 = vector.broadcast %cst_72 : f32 to vector<8x128xf32>
    %201 = arith.subf %191, %200 : vector<8x128xf32>
    %cst_73 = arith.constant 1.000000e+00 : f32
    %202 = vector.broadcast %cst_73 : f32 to vector<8x128xf32>
    %203 = arith.addf %191, %202 : vector<8x128xf32>
    %204 = arith.divf %201, %203 : vector<8x128xf32>
    %205 = arith.select %195, %204, %191 : vector<8x128xi1>, vector<8x128xf32>
    %206 = arith.select %193, %199, %205 : vector<8x128xi1>, vector<8x128xf32>
    %cst_74 = arith.constant 0.785398185 : f32
    %cst_75 = arith.constant 0.000000e+00 : f32
    %207 = vector.broadcast %cst_74 : f32 to vector<8x128xf32>
    %208 = vector.broadcast %cst_75 : f32 to vector<8x128xf32>
    %209 = arith.select %195, %207, %208 : vector<8x128xi1>, vector<8x128xf32>
    %cst_76 = arith.constant 1.57079637 : f32
    %210 = vector.broadcast %cst_76 : f32 to vector<8x128xf32>
    %211 = arith.select %193, %210, %209 : vector<8x128xi1>, vector<8x128xf32>
    %212 = arith.mulf %206, %206 : vector<8x128xf32>
    %cst_77 = arith.constant 0.0805374458 : f32
    %213 = vector.broadcast %cst_77 : f32 to vector<8x128xf32>
    %214 = arith.mulf %213, %212 : vector<8x128xf32>
    %cst_78 = arith.constant 0.138776854 : f32
    %215 = vector.broadcast %cst_78 : f32 to vector<8x128xf32>
    %216 = arith.subf %214, %215 : vector<8x128xf32>
    %217 = arith.mulf %216, %212 : vector<8x128xf32>
    %cst_79 = arith.constant 0.199777111 : f32
    %218 = vector.broadcast %cst_79 : f32 to vector<8x128xf32>
    %219 = arith.addf %217, %218 : vector<8x128xf32>
    %220 = arith.mulf %219, %212 : vector<8x128xf32>
    %cst_80 = arith.constant 0.333329499 : f32
    %221 = vector.broadcast %cst_80 : f32 to vector<8x128xf32>
    %222 = arith.subf %220, %221 : vector<8x128xf32>
    %223 = arith.mulf %222, %212 : vector<8x128xf32>
    %224 = arith.mulf %223, %206 : vector<8x128xf32>
    %225 = arith.addf %224, %206 : vector<8x128xf32>
    %226 = arith.addf %211, %225 : vector<8x128xf32>
    %cst_81 = arith.constant 0.000000e+00 : f32
    %227 = vector.broadcast %cst_81 : f32 to vector<8x128xf32>
    %228 = arith.cmpf olt, %190, %227 : vector<8x128xf32>
    %cst_82 = arith.constant 0.000000e+00 : f32
    %229 = vector.broadcast %cst_82 : f32 to vector<8x128xf32>
    %230 = arith.subf %229, %226 : vector<8x128xf32>
    %231 = arith.select %228, %230, %226 : vector<8x128xi1>, vector<8x128xf32>
    %cst_83 = arith.constant 0.000000e+00 : f32
    %232 = vector.broadcast %cst_83 : f32 to vector<8x128xf32>
    %233 = arith.cmpf ogt, %156, %232 : vector<8x128xf32>
    %cst_84 = arith.constant 0.000000e+00 : f32
    %234 = vector.broadcast %cst_84 : f32 to vector<8x128xf32>
    %235 = arith.cmpf olt, %156, %234 : vector<8x128xf32>
    %cst_85 = arith.constant 0.000000e+00 : f32
    %236 = vector.broadcast %cst_85 : f32 to vector<8x128xf32>
    %237 = arith.cmpf oge, %162, %236 : vector<8x128xf32>
    %cst_86 = arith.constant 3.14159274 : f32
    %cst_87 = arith.constant -3.14159274 : f32
    %238 = vector.broadcast %cst_86 : f32 to vector<8x128xf32>
    %239 = vector.broadcast %cst_87 : f32 to vector<8x128xf32>
    %240 = arith.select %237, %238, %239 : vector<8x128xi1>, vector<8x128xf32>
    %241 = arith.addf %231, %240 : vector<8x128xf32>
    %cst_88 = arith.constant 0.000000e+00 : f32
    %242 = vector.broadcast %cst_88 : f32 to vector<8x128xf32>
    %243 = arith.cmpf ogt, %162, %242 : vector<8x128xf32>
    %cst_89 = arith.constant 0.000000e+00 : f32
    %244 = vector.broadcast %cst_89 : f32 to vector<8x128xf32>
    %245 = arith.cmpf olt, %162, %244 : vector<8x128xf32>
    %cst_90 = arith.constant -1.57079637 : f32
    %cst_91 = arith.constant 0.000000e+00 : f32
    %246 = vector.broadcast %cst_90 : f32 to vector<8x128xf32>
    %247 = vector.broadcast %cst_91 : f32 to vector<8x128xf32>
    %248 = arith.select %245, %246, %247 : vector<8x128xi1>, vector<8x128xf32>
    %cst_92 = arith.constant 1.57079637 : f32
    %249 = vector.broadcast %cst_92 : f32 to vector<8x128xf32>
    %250 = arith.select %243, %249, %248 : vector<8x128xi1>, vector<8x128xf32>
    %251 = arith.select %235, %241, %250 : vector<8x128xi1>, vector<8x128xf32>
    %252 = arith.select %233, %231, %251 : vector<8x128xi1>, vector<8x128xf32>
    %c0_93 = arith.constant 0 : index
    %c0_94 = arith.constant 0 : index
    %253 = vector.load %arg18[%c0_93, %c0_94] : memref<8x128xf32, #tpu.memory_space<vmem>>, vector<8x128xf32>
    tpu.vector_store %arg18[%c0_93, %c0_94], %144 {strides = array<i32>} : memref<8x128xf32, #tpu.memory_space<vmem>>, vector<8x128xf32>,
    %c0_95 = arith.constant 0 : index
    %c0_96 = arith.constant 0 : index
    %254 = vector.load %arg19[%c0_95, %c0_96] : memref<8x128xf32, #tpu.memory_space<vmem>>, vector<8x128xf32>
    tpu.vector_store %arg19[%c0_95, %c0_96], %150 {strides = array<i32>} : memref<8x128xf32, #tpu.memory_space<vmem>>, vector<8x128xf32>,
    %c0_97 = arith.constant 0 : index
    %c0_98 = arith.constant 0 : index
    %255 = vector.load %arg20[%c0_97, %c0_98] : memref<8x128xf32, #tpu.memory_space<vmem>>, vector<8x128xf32>
    tpu.vector_store %arg20[%c0_97, %c0_98], %252 {strides = array<i32>} : memref<8x128xf32, #tpu.memory_space<vmem>>, vector<8x128xf32>,
    %256 = vector.shape_cast %173 : vector<8x128xf32> to vector<1x8x128xf32>
    %257 = vector.shape_cast %177 : vector<8x128xf32> to vector<1x8x128xf32>
    %258 = vector.shape_cast %185 : vector<8x128xf32> to vector<1x8x128xf32>
    %259 = tpu.concatenate %256, %257, %258 in 0 : vector<1x8x128xf32>, vector<1x8x128xf32>, vector<1x8x128xf32> -> vector<3x8x128xf32>
    %c0_99 = arith.constant 0 : index
    %c0_100 = arith.constant 0 : index
    %c0_101 = arith.constant 0 : index
    %260 = vector.load %arg21[%c0_99, %c0_100, %c0_101] : memref<3x8x128xf32, #tpu.memory_space<vmem>>, vector<3x8x128xf32>
    tpu.vector_store %arg21[%c0_99, %c0_100, %c0_101], %259 {strides = array<i32>} : memref<3x8x128xf32, #tpu.memory_space<vmem>>, vector<3x8x128xf32>,
    return
  }
  func.func @transform_0(%arg0: i32, %arg1: memref<12xf32, #tpu.memory_space<smem>>) -> (i32, i32) {
    %c0_i32 = arith.constant 0 : i32
    %c0_i32_0 = arith.constant 0 : i32
    return %arg0, %c0_i32 : i32, i32
  }
  func.func @transform_1(%arg0: i32, %arg1: memref<12xf32, #tpu.memory_space<smem>>) -> (i32, i32, i32) {
    %c0_i32 = arith.constant 0 : i32
    %c0_i32_0 = arith.constant 0 : i32
    %c0_i32_1 = arith.constant 0 : i32
    return %c0_i32, %arg0, %c0_i32_0 : i32, i32, i32
  }
  func.func @transform_2(%arg0: i32, %arg1: memref<12xf32, #tpu.memory_space<smem>>) -> (i32, i32) {
    %c0_i32 = arith.constant 0 : i32
    %c0_i32_0 = arith.constant 0 : i32
    return %arg0, %c0_i32 : i32, i32
  }
  func.func @transform_3(%arg0: i32, %arg1: memref<12xf32, #tpu.memory_space<smem>>) -> (i32, i32) {
    %c0_i32 = arith.constant 0 : i32
    %c0_i32_0 = arith.constant 0 : i32
    return %arg0, %c0_i32 : i32, i32
  }
  func.func @transform_4(%arg0: i32, %arg1: memref<12xf32, #tpu.memory_space<smem>>) -> (i32, i32) {
    %c0_i32 = arith.constant 0 : i32
    %c0_i32_0 = arith.constant 0 : i32
    return %arg0, %c0_i32 : i32, i32
  }
  func.func @transform_5(%arg0: i32, %arg1: memref<12xf32, #tpu.memory_space<smem>>) -> (i32, i32) {
    %c0_i32 = arith.constant 0 : i32
    %c0_i32_0 = arith.constant 0 : i32
    return %arg0, %c0_i32 : i32, i32
  }
  func.func @transform_6(%arg0: i32, %arg1: memref<12xf32, #tpu.memory_space<smem>>) -> (i32, i32) {
    %c0_i32 = arith.constant 0 : i32
    %c0_i32_0 = arith.constant 0 : i32
    return %arg0, %c0_i32 : i32, i32
  }
  func.func @transform_7(%arg0: i32, %arg1: memref<12xf32, #tpu.memory_space<smem>>) -> (i32, i32) {
    %c0_i32 = arith.constant 0 : i32
    %c0_i32_0 = arith.constant 0 : i32
    return %arg0, %c0_i32 : i32, i32
  }
  func.func @transform_8(%arg0: i32, %arg1: memref<12xf32, #tpu.memory_space<smem>>) -> (i32, i32) {
    %c0_i32 = arith.constant 0 : i32
    %c0_i32_0 = arith.constant 0 : i32
    return %arg0, %c0_i32 : i32, i32
  }
  func.func @transform_9(%arg0: i32, %arg1: memref<12xf32, #tpu.memory_space<smem>>) -> (i32, i32, i32) {
    %c0_i32 = arith.constant 0 : i32
    %c0_i32_0 = arith.constant 0 : i32
    %c0_i32_1 = arith.constant 0 : i32
    return %c0_i32, %arg0, %c0_i32_0 : i32, i32, i32
  }
  func.func @transform_10(%arg0: i32, %arg1: memref<12xf32, #tpu.memory_space<smem>>) -> (i32, i32, i32) {
    %c0_i32 = arith.constant 0 : i32
    %c0_i32_0 = arith.constant 0 : i32
    %c0_i32_1 = arith.constant 0 : i32
    return %c0_i32, %arg0, %c0_i32_0 : i32, i32, i32
  }
  func.func @transform_11(%arg0: i32, %arg1: memref<12xf32, #tpu.memory_space<smem>>) -> (i32, i32, i32) {
    %c0_i32 = arith.constant 0 : i32
    %c0_i32_0 = arith.constant 0 : i32
    %c0_i32_1 = arith.constant 0 : i32
    return %c0_i32, %arg0, %c0_i32_0 : i32, i32, i32
  }
  func.func @transform_12(%arg0: i32, %arg1: memref<12xf32, #tpu.memory_space<smem>>) -> (i32, i32) {
    %c0_i32 = arith.constant 0 : i32
    %c0_i32_0 = arith.constant 0 : i32
    return %arg0, %c0_i32 : i32, i32
  }
  func.func @transform_13(%arg0: i32, %arg1: memref<12xf32, #tpu.memory_space<smem>>) -> (i32, i32) {
    %c0_i32 = arith.constant 0 : i32
    %c0_i32_0 = arith.constant 0 : i32
    return %arg0, %c0_i32 : i32, i32
  }
  func.func @transform_14(%arg0: i32, %arg1: memref<12xf32, #tpu.memory_space<smem>>) -> (i32, i32) {
    %c0_i32 = arith.constant 0 : i32
    %c0_i32_0 = arith.constant 0 : i32
    return %arg0, %c0_i32 : i32, i32
  }
  func.func @transform_15(%arg0: i32, %arg1: memref<12xf32, #tpu.memory_space<smem>>) -> (i32, i32) {
    %c0_i32 = arith.constant 0 : i32
    %c0_i32_0 = arith.constant 0 : i32
    return %arg0, %c0_i32 : i32, i32
  }
  func.func @transform_16(%arg0: i32, %arg1: memref<12xf32, #tpu.memory_space<smem>>) -> (i32, i32) {
    %c0_i32 = arith.constant 0 : i32
    %c0_i32_0 = arith.constant 0 : i32
    return %arg0, %c0_i32 : i32, i32
  }
  func.func @transform_17(%arg0: i32, %arg1: memref<12xf32, #tpu.memory_space<smem>>) -> (i32, i32) {
    %c0_i32 = arith.constant 0 : i32
    %c0_i32_0 = arith.constant 0 : i32
    return %arg0, %c0_i32 : i32, i32
  }
  func.func @transform_18(%arg0: i32, %arg1: memref<12xf32, #tpu.memory_space<smem>>) -> (i32, i32) {
    %c0_i32 = arith.constant 0 : i32
    %c0_i32_0 = arith.constant 0 : i32
    return %arg0, %c0_i32 : i32, i32
  }
  func.func @transform_19(%arg0: i32, %arg1: memref<12xf32, #tpu.memory_space<smem>>) -> (i32, i32, i32) {
    %c0_i32 = arith.constant 0 : i32
    %c0_i32_0 = arith.constant 0 : i32
    %c0_i32_1 = arith.constant 0 : i32
    return %c0_i32, %arg0, %c0_i32_0 : i32, i32, i32
  }
}

</mosaic_0001>

<bundles_post_ra>
// kernel: condnet_inference_device.1
= control target key start
LH: loop header
LB: loop body
LE: loop exit
PB: predicated region body
PF: predicated region fallthrough
CT: control target
= control target key end

     0   :  { %s1529_s0 = inlined_call_operand.hbm [shape: f32[12], index: 0, kind: input, shape index: {}]   ;;  %s1530_s1 = inlined_call_operand.hbm [shape: f32[8,128], index: 1, kind: input, shape index: {}]   ;;  %s1531_s2 = inlined_call_operand.hbm [shape: f32[3,8,128], index: 2, kind: input, shape index: {}]   ;;  %s1532_s3 = inlined_call_operand.hbm [shape: f32[8,128], index: 3, kind: input, shape index: {}]   ;;  %s1533_s4 = inlined_call_operand.hbm [shape: f32[8,128], index: 4, kind: input, shape index: {}]   ;;  %s1534_s5 = inlined_call_operand.vmem [shape: f32[8,128], index: 5, kind: input, shape index: {}]   ;;  %s1535_s6 = inlined_call_operand.hbm [shape: f32[8,128], index: 6, kind: input, shape index: {}]   ;;  %s1536_s7 = inlined_call_operand.hbm [shape: f32[8,128], index: 7, kind: input, shape index: {}]   ;;  %s1537_s8 = inlined_call_operand.hbm [shape: f32[8,128], index: 8, kind: input, shape index: {}]   ;;  %s1538_s9 = inlined_call_operand.vmem [shape: f32[8,128], index: 9, kind: input, shape index: {}]   ;;  %s1539_s10 = inlined_call_operand.hbm [shape: f32[4,8,128], index: 10, kind: input, shape index: {}]   ;;  %s1540_s11 = inlined_call_operand.hbm [shape: f32[3,8,128], index: 11, kind: input, shape index: {}]   ;;  %s1541_s12 = inlined_call_operand.hbm [shape: f32[4,8,128], index: 12, kind: input, shape index: {}]   ;;  %s1542_s13 = inlined_call_operand.hbm [shape: f32[8,128], index: 13, kind: output, shape index: {0}]   ;;  %s1543_s14 = inlined_call_operand.hbm [shape: f32[8,128], index: 14, kind: output, shape index: {1}]   ;;  %s1544_s15 = inlined_call_operand.hbm [shape: f32[8,128], index: 15, kind: output, shape index: {2}]   ;;  %s1545_s16 = inlined_call_operand.hbm [shape: f32[8,128], index: 16, kind: output, shape index: {3}]   ;;  %s1546_s17 = inlined_call_operand.hbm [shape: f32[8,128], index: 17, kind: output, shape index: {4}]   ;;  %s1547_s18 = inlined_call_operand.hbm [shape: f32[8,128], index: 18, kind: output, shape index: {5}]   ;;  %s1548_s19 = inlined_call_operand.hbm [shape: f32[8,128], index: 19, kind: output, shape index: {6}]   ;;  %s1549_s20 = inlined_call_operand.hbm [shape: f32[3,8,128], index: 20, kind: output, shape index: {7}]  }
   0x1   :  { %1550 = sst [smem:[#allocation45_spill]] %s1529_s0 }
   0x2   :  { %1551 = sst [smem:[#allocation46_spill]] %s1530_s1  ;;  %s1126_s1 = smov [#allocation3]  }
   0x3   :  { %1552 = sst [smem:[#allocation47_spill]] %s1531_s2 }
   0x4   :  { %1553 = sst [smem:[#allocation48_spill]] %s1532_s3 }
   0x5   :  { %1554 = sst [smem:[#allocation49_spill]] %s1533_s4 }
   0x6   :  { %1555 = sst [smem:[#allocation50_spill]] %s1538_s9 }
   0x7   :  { %s1556_s9 = sld [smem:[#allocation45_spill]] }
   0xd   :  { %27 = dma.hbm_to_smem %s1556_s9, 16, %s1126_s1, [#allocation2] }
   0xe   :  { %1082 = dma.done.wait [#allocation2], 16 }
   0xf   :  { %1083 = vsyncadd [#allocation2], 4294967280 }
  0x10   :  { %29 = sfence }
  0x11   :  { %30 = vsyncpa [#allocation5], 0 }
  0x12   :  { %31 = vsyncpa [#allocation8], 0 }
  0x13   :  { %32 = vsyncpa [#allocation11], 0 }
  0x14   :  { %33 = vsyncpa [#allocation14], 0 }
  0x15   :  { %34 = vsyncpa [#allocation17], 0 }
  0x16   :  { %35 = vsyncpa [#allocation20], 0 }
  0x17   :  { %36 = vsyncpa [#allocation6], 0 }
  0x18   :  { %37 = vsyncpa [#allocation23], 0 }
  0x19   :  { %38 = vsyncpa [#allocation26], 0 }
  0x1a   :  { %39 = vsyncpa [#allocation29], 0 }
  0x1b   :  { %40 = vsyncpa [#allocation32], 0  ;;  %s1127_s24 = smov [#allocation7]  }
  0x1c   :  { %s56_s2 = sshll.u32 %s1127_s24, 4  ;;  %s57_s2 = int_to_ptr.vmem [resolvable:$true] %s56_s2 }
  0x1d   :  { %s710_s25 = scalar_lea.vmem %s57_s2, 384  ;;  %p715_p1 = scmp.lt.s32.totalorder %s57_s2, %s57_s2 }
  0x1e   :  { %p711_p0 = scmp.ne.s32.totalorder %s57_s2, %s710_s25  ;;  %p716_p2 = scmp.lt.s32.totalorder %s710_s25, %s710_s25 }
  0x20   :  { %p717_p3 = por %p716_p2, %p715_p1 }
  0x22   :  { %p718_p4 = pnand %p717_p3, %p711_p0 }
  0x24   :  { %721 = shalt.err (!%p718_p4)
}
  0x25   :  { %s1128_s9 = smov 128   ;;  %s1129_s3 = smov 8  }
  0x26   :  { %s1557_s28 = sld [smem:[#allocation47_spill]]  ;;  %s1130_s4 = smov [#allocation10]  }
  0x27   :  { %s79_s29 = sshll.u32 %s1130_s4, 4  ;;  %s1131_s30 = smov [#allocation13]   ;;  %s80_s29 = int_to_ptr.vmem [resolvable:$true] %s79_s29 }
  0x28   :  { %s101_s0 = sshll.u32 %s1131_s30, 4  ;;  %s730_s21 = scalar_lea.vmem %s80_s29, 128  ;;  %s102_s0 = int_to_ptr.vmem [resolvable:$true] %s101_s0 }
  0x29   :  { %p731_p5 = scmp.ne.s32.totalorder %s80_s29, %s730_s21  ;;  %p735_p6 = scmp.lt.s32.totalorder %s80_s29, %s80_s29 }
  0x2a   :  { %p736_p7 = scmp.lt.s32.totalorder %s730_s21, %s730_s21 }
  0x2c   :  { %62 = dma.hbm_to_vmem [thread:$0]  %s1557_s28, 384, %s57_s2, [#allocation8], %s1128_s9, %s1128_s9, %s1129_s3  }
  0x2d   :  { %p737_p8 = por %p736_p7, %p735_p6 }
  0x2f   :  { %p738_p9 = pnand %p737_p8, %p731_p5 }
  0x31   :  { %741 = shalt.err (!%p738_p9)
}
  0x32   :  { %s1558_s23 = sld [smem:[#allocation49_spill]]  ;;  %s750_s24 = scalar_lea.vmem %s102_s0, 128 }
  0x33   :  { %p751_p10 = scmp.ne.s32.totalorder %s102_s0, %s750_s24  ;;  %p755_p11 = scmp.lt.s32.totalorder %s102_s0, %s102_s0 }
  0x34   :  { %p756_p12 = scmp.lt.s32.totalorder %s750_s24, %s750_s24 }
  0x36   :  { %p757_p13 = por %p756_p12, %p755_p11 }
  0x38   :  { %82 = dma.hbm_to_vmem [thread:$0]  %s1558_s23, 128, %s80_s29, [#allocation11]  }
  0x39   :  { %p758_p0 = pnand %p757_p13, %p751_p10 }
  0x3b   :  { %761 = shalt.err (!%p758_p0)
}
  0x3c   :  { %104 = dma.hbm_to_vmem [thread:$0]  %s1536_s7, 128, %s102_s0, [#allocation14]  }
  0x3d   :  { %s1132_s26 = smov [#allocation16]   ;;  %s1133_s28 = smov [#allocation4]  }
  0x3e   :  { %s122_s27 = sshll.u32 %s1132_s26, 4  ;;  %s47_s4 = sshll.u32 %s1133_s28, 4  ;;  %s123_s27 = int_to_ptr.vmem [resolvable:$true] %s122_s27  ;;  %s48_s4 = int_to_ptr.vmem [resolvable:$true] %s47_s4 }
  0x3f   :  { %s770_s30 = scalar_lea.vmem %s123_s27, 512  ;;  %p775_p2 = scmp.lt.s32.totalorder %s123_s27, %s123_s27 }
  0x40   :  { %p771_p1 = scmp.ne.s32.totalorder %s123_s27, %s770_s30  ;;  %p776_p3 = scmp.lt.s32.totalorder %s770_s30, %s770_s30 }
  0x42   :  { %p777_p4 = por %p776_p3, %p775_p2 }
  0x44   :  { %p778_p5 = pnand %p777_p4, %p771_p1 }
  0x46   :  { %781 = shalt.err (!%p778_p5)
}
  0x47   :  { %128 = dma.hbm_to_vmem [thread:$0]  %s1539_s10, 512, %s123_s27, [#allocation17], %s1128_s9, %s1128_s9, %s1129_s3  }
  0x48   :  { %s790_s7 = scalar_lea.vmem %s48_s4, 128  ;;  %p795_p7 = scmp.lt.s32.totalorder %s48_s4, %s48_s4 }
  0x49   :  { %p791_p6 = scmp.ne.s32.totalorder %s48_s4, %s790_s7  ;;  %p796_p8 = scmp.lt.s32.totalorder %s790_s7, %s790_s7 }
  0x4b   :  { %p797_p9 = por %p796_p8, %p795_p7 }
  0x4d   :  { %p798_p10 = pnand %p797_p9, %p791_p6 }
  0x4f   :  { %801 = shalt.err (!%p798_p10)
}
  0x50   :  { %s1559_s22 = sld [smem:[#allocation46_spill]]  ;;  %s1134_s23 = smov [#allocation9]  }
  0x51   :  { %s69_s24 = sshll.u32 %s1134_s23, 4  ;;  %s1135_s2 = smov [#allocation12]   ;;  %s70_s24 = int_to_ptr.vmem [resolvable:$true] %s69_s24 }
  0x52   :  { %s91_s25 = sshll.u32 %s1135_s2, 4  ;;  %s810_s26 = scalar_lea.vmem %s70_s24, 128  ;;  %s92_s25 = int_to_ptr.vmem [resolvable:$true] %s91_s25 }
  0x53   :  { %p811_p11 = scmp.ne.s32.totalorder %s70_s24, %s810_s26  ;;  %p815_p12 = scmp.lt.s32.totalorder %s70_s24, %s70_s24 }
  0x54   :  { %p816_p13 = scmp.lt.s32.totalorder %s810_s26, %s810_s26 }
  0x56   :  { %50 = dma.hbm_to_vmem [thread:$0]  %s1559_s22, 128, %s48_s4, [#allocation5]  }
  0x57   :  { %p817_p0 = por %p816_p13, %p815_p12 }
  0x59   :  { %p818_p1 = pnand %p817_p0, %p811_p11 }
  0x5b   :  { %821 = shalt.err (!%p818_p1)
}
  0x5c   :  { %s1560_s28 = sld [smem:[#allocation48_spill]]  ;;  %s830_s30 = scalar_lea.vmem %s92_s25, 128 }
  0x5d   :  { %p831_p2 = scmp.ne.s32.totalorder %s92_s25, %s830_s30  ;;  %p835_p3 = scmp.lt.s32.totalorder %s92_s25, %s92_s25 }
  0x5e   :  { %p836_p4 = scmp.lt.s32.totalorder %s830_s30, %s830_s30 }
  0x60   :  { %p837_p5 = por %p836_p4, %p835_p3 }
  0x62   :  { %72 = dma.hbm_to_vmem [thread:$0]  %s1560_s28, 128, %s70_s24, [#allocation8]  }
  0x63   :  { %p838_p6 = pnand %p837_p5, %p831_p2 }
  0x65   :  { %841 = shalt.err (!%p838_p6)
}
  0x66   :  { %94 = dma.hbm_to_vmem [thread:$0]  %s1535_s6, 128, %s92_s25, [#allocation11]  }
  0x67   :  { %s1136_s21 = smov [#allocation15]   ;;  %s1137_s0 = smov [#allocation18]  }
  0x68   :  { %s111_s7 = sshll.u32 %s1136_s21, 4  ;;  %s134_s1 = sshll.u32 %s1137_s0, 4  ;;  %s112_s7 = int_to_ptr.vmem [resolvable:$true] %s111_s7  ;;  %s135_s1 = int_to_ptr.vmem [resolvable:$true] %s134_s1 }
  0x69   :  { %s850_s22 = scalar_lea.vmem %s112_s7, 128  ;;  %p855_p8 = scmp.lt.s32.totalorder %s112_s7, %s112_s7 }
  0x6a   :  { %p851_p7 = scmp.ne.s32.totalorder %s112_s7, %s850_s22  ;;  %p856_p9 = scmp.lt.s32.totalorder %s850_s22, %s850_s22 }
  0x6c   :  { %p857_p10 = por %p856_p9, %p855_p8 }
  0x6e   :  { %p858_p11 = pnand %p857_p10, %p851_p7 }
  0x70   :  { %861 = shalt.err (!%p858_p11)
}
  0x71   :  { %114 = dma.hbm_to_vmem [thread:$0]  %s1537_s8, 128, %s112_s7, [#allocation14]  }
  0x72   :  { %s870_s2 = scalar_lea.vmem %s135_s1, 384  ;;  %p875_p13 = scmp.lt.s32.totalorder %s135_s1, %s135_s1 }
  0x73   :  { %p871_p12 = scmp.ne.s32.totalorder %s135_s1, %s870_s2  ;;  %p876_p0 = scmp.lt.s32.totalorder %s870_s2, %s870_s2 }
  0x75   :  { %p877_p1 = por %p876_p0, %p875_p13 }
  0x77   :  { %p878_p2 = pnand %p877_p1, %p871_p12 }
  0x79   :  { %881 = shalt.err (!%p878_p2)
}
  0x7a   :  { %140 = dma.hbm_to_vmem [thread:$0]  %s1540_s11, 384, %s135_s1, [#allocation17], %s1128_s9, %s1128_s9, %s1129_s3  }
  0x7b   :  { %s1138_s26 = smov [#allocation19]  }
  0x7c   :  { %s146_s10 = sshll.u32 %s1138_s26, 4  ;;  %s147_s10 = int_to_ptr.vmem [resolvable:$true] %s146_s10 }
  0x7d   :  { %s890_s27 = scalar_lea.vmem %s147_s10, 512  ;;  %p895_p4 = scmp.lt.s32.totalorder %s147_s10, %s147_s10 }
  0x7e   :  { %p891_p3 = scmp.ne.s32.totalorder %s147_s10, %s890_s27  ;;  %p896_p5 = scmp.lt.s32.totalorder %s890_s27, %s890_s27 }
  0x80   :  { %p897_p6 = por %p896_p5, %p895_p4 }
  0x82   :  { %p898_p7 = pnand %p897_p6, %p891_p3 }
  0x84   :  { %901 = shalt.err (!%p898_p7)
}
  0x85   :  { %152 = dma.hbm_to_vmem [thread:$0]  %s1541_s12, 512, %s147_s10, [#allocation20], %s1128_s9, %s1128_s9, %s1129_s3  }
  0x86   :  { %1084 = dma.done.wait [#allocation5], 128  }
  0x87   :  { %1085 = vsyncadd [#allocation5], 4294967168 }
  0x88   :  { %1086 = dma.done.wait [#allocation8], 512  }
  0x89   :  { %1087 = vsyncadd [#allocation8], 4294966784 }
  0x8a   :  { %1088 = dma.done.wait [#allocation11], 256  }
  0x8b   :  { %1089 = vsyncadd [#allocation11], 4294967040 }
  0x8c   :  { %1090 = dma.done.wait [#allocation14], 256  }
  0x8d   :  { %1091 = vsyncadd [#allocation14], 4294967040 }
  0x8e   :  { %1092 = dma.done.wait [#allocation17], 896  }
  0x8f   :  { %1093 = vsyncadd [#allocation17], 4294966400 }
  0x90   :  { %1094 = dma.done.wait [#allocation20], 512  }
  0x91   :  { %1095 = vsyncadd [#allocation20], 4294966784  ;;  %v203_v0 = vlaneseq  ;;  %s1301_s11 = sld [smem:[#allocation3]]  ;;  %v1318_v3 = vld [vmem:[#allocation4] sm:$0xff]  ;;  %v1320_v4 = vld [vmem:[#allocation7] sm:$0xff]  ;;  %s1358_s6 = smov 4294967295  }
  0x92   :  { %s1303_s30 = sld [smem:[#allocation3 + $0x1]]  ;;  %v1322_v5 = vld [vmem:[#allocation7 + $0x8] sm:$0xff]  ;;  %v1329_v7 = vld [vmem:[#allocation7 + $0x10] sm:$0xff]  ;;  %v1331_v8 = vld [vmem:[#allocation9] sm:$0xff]  ;;  %v1360_v11 = vmov 0.0   ;;  %v1362_v12 = vmov -1.0  }
  0x93   :  { %v1305_v1 = vand.u32 127, %v203_v0  ;;  %s1307_s12 = sld [smem:[#allocation3 + $0x2]]  ;;  %vm201_vm1 = vcmp.eq.f32.partialorder %v1331_v8, 1.0  ;;  %vm202_vm2 = vcmp.eq.f32.partialorder %v1331_v8, 0.0  ;;  %v1364_v13 = vmov 0.0   ;;  %s1366_s25 = smov 0  }
  0x94   :  { %s1309_s4 = sld [smem:[#allocation3 + $0x3]] }
  0x95   :  { %v205_v2 = vcvt.s32.f32 %v1305_v1  ;;  %s1312_s29 = sld [smem:[#allocation3 + $0x4]] }
  0x96   :  { %s1314_s21 = sld [smem:[#allocation3 + $0x5]] }
  0x97   :  { %s1316_s7 = sld [smem:[#allocation3 + $0x6]]  ;;  %v206_v6 = vstv %s1301_s11 }
  0x98   :  { %s185_s0 = smul.f32 %s1303_s30, %s1303_s30  ;;  %s1327_s1 = sld [smem:[#allocation3 + $0x7]]  ;;  %vm1336_vm0 = vcmp.ge.f32.partialorder %v1318_v3, %v206_v6 }
  0x99   :  { %s1340_s22 = sld [smem:[#allocation3 + $0x8]]  ;;  %vm1350_vm3 = vmor %vm1336_vm0, %vm201_vm1 }
  0x9a   :  { %s1344_s23 = sld [smem:[#allocation3 + $0x9]] }
  0x9b   :  { %s1354_s24 = sld [smem:[#allocation3 + $0xa]] }
  0x9c   :  { %s1356_s2 = sld [smem:[#allocation3 + $0xb]] }
  0x9d LB: > { %v222_v14 = vsub.f32 1.0, %v1120_v13  ;;  %v1139_v24 = vmov 0.0   ;;  %s297_s26 = sadd.s32 1, %s1124_s25   ;;  %v264_v39 = vstv %s185_s0  ;;  %vm263_vm6 = vcmp.eq.f32.partialorder %v1120_v13, 0.0  ;;  %s271_s10 = scvt.s32.f32 %s1124_s25  ;;  %s1124_s25 = sphi %s1366_s25, %s1572_s25   ;;  %v1120_v13 = vphi %v1364_v13, %v1571_v13   ;;  %v1116_v12 = vphi %v1362_v12, %v1570_v12   ;;  %v1112_v11 = vphi %v1360_v11, %v1569_v11   ;;  %s1108_s6 = sphi %s1358_s6, %s1568_s6  }
  0x9e   : > { %v1140_v44 = vmov 0   ;;  %s1572_s25 = smov %s297_s26 }
  0x9f   : > { %v224_v15 = vmul.f32 %v222_v14, %v1331_v8  ;;  %v223_v16 = vmul.f32 %v222_v14, %v1318_v3  ;;  %v272_v41 = vstv %s271_s10 }
  0xa1   : > { %v225_v17 = vmul.f32 999.0, %v224_v15 }
  0xa3   : > { %v226_v18 = vadd.f32 1.0, %v225_v17 }
  0xa5   : > { %v227_v19 = vmul.f32 %v226_v18, %v223_v16 }
  0xa7   : > { %228 = vmax.xlane.f32.xlu0 %v227_v19 }
 0x130   : > { %v229_v20 = vpop.xlane.xlu0 %228 }
 0x131   : > { %vm230_vm4 = vcmp.eq.f32.partialorder %v227_v19, %v229_v20 }
 0x132   : > { %v231_v21 = vsel %vm230_vm4, %v205_v2, 128.0 }
 0x133   : > { %232 = vmin.xlane.f32.xlu0 %v231_v21 }
 0x1bc   : > { %v233_v22 = vpop.xlane.xlu0 %232 }
 0x1bd   : > { %vm1385_vm5 = vcmp.eq.f32.partialorder %v205_v2, %v233_v22 }
 0x1be   : > { %v606_v25 = vsel %vm1385_vm5, 1.0, %v1139_v24  ;;  %vm254_vm7 = vmand %vm1385_vm5, %vm201_vm1 }
 0x1bf   : > { %v242_v26 = vmul.f32 %v606_v25, %v1329_v7  ;;  %v240_v27 = vmul.f32 %v606_v25, %v1320_v4  ;;  %v241_v28 = vmul.f32 %v606_v25, %v1322_v5  ;;  %v237_v50 = vmul.f32 %v606_v25, %v223_v16 }
 0x1c1   : > { %247 = vadd.xlane.f32.xlu0 %v242_v26  ;;  %243 = vadd.xlane.f32.xlu1 %v240_v27 }
 0x1c5   : > { %245 = vadd.xlane.f32.xlu1 %v241_v28 }
 0x24a   : > { %v244_v29 = vpop.xlane.xlu1 %243  ;;  %v248_v30 = vpop.xlane.xlu0 %247 }
 0x24b   : > { %v255_v31 = vsub.f32 %v244_v29, %v1320_v4  ;;  %v257_v33 = vsub.f32 %v248_v30, %v1329_v7 }
 0x24d   : > { %v258_v35 = vmul.f32 %v255_v31, %v255_v31  ;;  %v260_v37 = vmul.f32 %v257_v33, %v257_v33 }
 0x24e   : > { %v246_v32 = vpop.xlane.xlu1 %245 }
 0x24f   : > { %v256_v34 = vsub.f32 %v246_v32, %v1322_v5 }
 0x251   : > { %v259_v36 = vmul.f32 %v256_v34, %v256_v34 }
 0x253   : > { %v261_v38 = vadd.f32 %v259_v36, %v258_v35 }
 0x255   : > { %v262_v40 = vadd.f32 %v261_v38, %v260_v37 }
 0x257   : > { %vm265_vm8 = vcmp.le.f32.partialorder %v262_v40, %v264_v39 }
 0x258   : > { %vm266_vm9 = vmand %vm263_vm6, %vm265_vm8 }
 0x259   : > { %vm267_vm10 = vmand %vm266_vm9, %vm1336_vm0 }
 0x25a   : > { %vm268_vm11 = vmand %vm267_vm10, %vm202_vm2 }
 0x25b   : > { %vm269_vm12 = vmor %vm268_vm11, %vm254_vm7 }
 0x25c   : > { %v274_v42 = vsel %vm269_vm12, 1.0, %v1120_v13   ;;  %v273_v43 = vsel %vm269_vm12, %v272_v41, %v1116_v12  }
 0x25d   : > { %vm275_vm13 = vcmp.lt.f32.partialorder %v274_v42, 1.0  ;;  %v1570_v12 = vmov %v273_v43  ;;  %v1571_v13 = vmov %v274_v42 }
 0x25e   : > { %vm276_vm14 = vmand %vm1350_vm3, %vm275_vm13 }
 0x25f   : > { %v277_v45 = vsel %vm276_vm14, 1, %v1140_v44 }
 0x260   : > { %v279_v46 = vshrl.u32 %v277_v45, 16  ;;  %v278_v47 = vand.u32 65535, %v277_v45 }
 0x262   : > { %v281_v48 = vcvt.s32.f32 %v279_v46  ;;  %v280_v49 = vcvt.s32.f32 %v278_v47 }
 0x264   : > { %284 = vadd.xlane.f32.xlu1 %v281_v48  ;;  %282 = vadd.xlane.f32.xlu0 %v280_v49 }
 0x268   : > { %238 = vadd.xlane.f32.xlu1 %v237_v50 }
 0x2ed   : > { %v285_v51 = vpop.xlane.xlu1 %284  ;;  %v283_v52 = vpop.xlane.xlu0 %282 }
 0x2ee   : > { %v287_v53 = vcvt.f32.s32 %v285_v51  ;;  %v286_v55 = vcvt.f32.s32 %v283_v52 }
 0x2f0   : > { %v288_v54 = vshll.u32 %v287_v53, 16 }
 0x2f1   : > { %v239_v56 = vpop.xlane.xlu1 %238 }
 0x2f2   : > { %v289_v57 = vadd.s32 %v288_v54, %v286_v55  ;;  %vm249_vm15 = vcmp.ge.f32.partialorder %v239_v56, %v206_v6 }
 0x2f3   : > { %vm252_vm4 = vmor %vm249_vm15, %vm201_vm1 }
 0x2f4   : > { %v290_v58 = vrot.slane %v289_v57, 4  ;;  %vm253_vm6 = vmand %vm1385_vm5, %vm252_vm4 }
 0x2f5   : > { %v1419_v11 = vsel %vm253_vm6, 1.0, %v1112_v11  }
 0x2f6   : > { %v1567_v59 = vmov %v1419_v11  ;;  %v291_v60 = vadd.s32 %v290_v58, %v289_v57 }
 0x2f7   : > { %v1569_v11 = vmov %v1567_v59 }
 0x2f8   : > { %v292_v61 = vrot.slane %v291_v60, 2 }
 0x2fa   : > { %v293_v62 = vadd.s32 %v292_v61, %v291_v60 }
 0x2fc   : > { %v294_v63 = vrot.slane %v293_v62, 1 }
 0x2fe   : > { %v295_v0 = vadd.s32 %v294_v63, %v293_v62 }
 0x300   : > { %611 = vpush %v295_v0 }
 0x331   : > { %s612_s27 = spop %611  }
 0x332   : > { %p216_p8 = scmp.eq.s32.totalorder %s612_s27, 0  ;;  %p217_p9 = scmp.eq.s32.totalorder %s612_s27, %s1108_s6 }
 0x333   : > { %s1568_s6 = smov %s612_s27 }
 0x334   : > { %p218_p10 = por %p217_p9, %p216_p8 }
 0x335   :  { %299 = vst [vmem:[#allocation22] sm:$0xff] (%p218_p10), %v273_v43  ;;  %v303_v13 = vld [vmem:[#allocation16] sm:$0xff] (%p218_p10)  ;;  %v304_v14 = vld [vmem:[#allocation16 + $0x8] sm:$0xff] (%p218_p10)  ;;  %v335_v15 = vstv (%p218_p10), %s1307_s12  ;;  %298 = vst [vmem:[#allocation21] sm:$0xff] (%p218_p10), %v274_v42  ;;  %s1141_s8 = smov (%p218_p10), [#allocation22]   ;;  %v1142_v20 = vmov (%p218_p10), 0.0   ;;  %v337_v1 = vstv (%p218_p10), %s1309_s4 }
 0x336   :  { %221 = sbr.rel (!%p218_p10) target bundleno = 157 (0x9d), region = 171  ;;  %v305_v16 = vld [vmem:[#allocation16 + $0x10] sm:$0xff] (%p218_p10)  ;;  %v306_v17 = vld [vmem:[#allocation16 + $0x18] sm:$0xff] (%p218_p10)  ;;  %vm307_vm5 = vcmp.gt.f32.partialorder (%p218_p10), %v304_v14, %v303_v13  ;;  %v315_v18 = vld [vmem:[#allocation18] sm:$0xff] (%p218_p10)  ;;  %s474_s28 = sshll.u32 (%p218_p10), %s1141_s8, 4  ;;  %s475_s28 = int_to_ptr.vmem [resolvable:$true] %s474_s28 }
 0x337   :  { %v308_v19 = vsel (%p218_p10), %vm307_vm5, %v304_v14, %v303_v13  ;;  %v309_v21 = vsel (%p218_p10), %vm307_vm5, 1.0, %v1142_v20  ;;  %v316_v22 = vld [vmem:[#allocation18 + $0x8] sm:$0xff] (%p218_p10)  ;;  %v317_v23 = vld [vmem:[#allocation18 + $0x10] sm:$0xff] (%p218_p10)  ;;  %s902_s11 = scalar_lea.vmem (%p218_p10), %s475_s28, 128  ;;  %p907_p12 = scmp.lt.s32.totalorder (%p218_p10), %s475_s28, %s475_s28 }
 0x338   :  { %v1437_v24 = vld [vmem:[#allocation12] sm:$0xff] (%p218_p10)  ;;  %vm310_vm0 = vcmp.gt.f32.partialorder (%p218_p10), %v305_v16, %v308_v19  ;;  %vm318_vm3 = vcmp.gt.f32.partialorder (%p218_p10), %v316_v22, %v315_v18  ;;  %p903_p11 = scmp.ne.s32.totalorder (%p218_p10), %s475_s28, %s902_s11  ;;  %p908_p13 = scmp.lt.s32.totalorder (%p218_p10), %s902_s11, %s902_s11 }
 0x339   :  { %vm334_vm7 = vcmp.ne.f32.partialorder (%p218_p10), %v1437_v24, 0.0  ;;  %v336_v2 = vmul.f32 (%p218_p10), %v335_v15, %v1437_v24 }
 0x33a   :  { %p909_p0 = por (%p218_p10), %p908_p13, %p907_p12 }
 0x33c   :  { %p910_p1 = pnand %p909_p0, %p903_p11 }
 0x33e   :  { %913 = shalt.err (!%p910_p1)
}
 0x33f   :  { %477 = dma.vmem_to_hbm [thread:$0]  %s475_s28, 128, %s1543_s14, [#allocation23]   ;;  %v311_v3 = vsel %vm310_vm0, %v305_v16, %v308_v19  ;;  %v312_v4 = vsel %vm310_vm0, 2.0, %v309_v21  ;;  %v319_v5 = vsel %vm318_vm3, %v316_v22, %v315_v18  ;;  %v320_v6 = vsel %vm318_vm3, 1.0, %v1142_v20  ;;  %v300_v11 = vld [vmem:[#allocation10] sm:$0xff] }
 0x340   :  { %vm313_vm8 = vcmp.gt.f32.partialorder %v306_v17, %v311_v3  ;;  %vm321_vm9 = vcmp.gt.f32.partialorder %v317_v23, %v319_v5  ;;  %v338_v7 = vadd.f32 %v337_v1, %v336_v2  ;;  %s1143_s4 = smov [#allocation21]  }
 0x341   :  { %v314_v9 = vsel %vm313_vm8, 3.0, %v312_v4  ;;  %v322_v10 = vsel %vm321_vm9, 2.0, %v320_v6  ;;  %s464_s0 = sshll.u32 %s1143_s4, 4  ;;  %s465_s0 = int_to_ptr.vmem [resolvable:$true] %s464_s0 }
 0x342   :  { %v323_v12 = vadd.f32 2.0, %v322_v10  ;;  %v339_v25 = vsel %vm334_vm7, %v338_v7, %v1437_v24  ;;  %s922_s14 = scalar_lea.vmem %s465_s0, 128  ;;  %p927_p3 = scmp.lt.s32.totalorder %s465_s0, %s465_s0 }
 0x343   :  { %v340_v26 = vmul.f32 1.442695, %v339_v25  ;;  %p923_p2 = scmp.ne.s32.totalorder %s465_s0, %s922_s14  ;;  %p928_p4 = scmp.lt.s32.totalorder %s922_s14, %s922_s14 }
 0x345   :  { %p929_p5 = por %p928_p4, %p927_p3 }
 0x347   :  { %p930_p6 = pnand %p929_p5, %p923_p2 }
 0x349   :  { %933 = shalt.err (!%p930_p6)
}
 0x34a   :  { %467 = dma.vmem_to_hbm [thread:$0]  %s465_s0, 128, %s1542_s13, [#allocation6]   ;;  %v324_v27 = vsel %vm201_vm1, %v323_v12, %v314_v9  ;;  %v327_v28 = vsub.f32 1.0, %v300_v11  ;;  %v301_v29 = vld [vmem:[%s1534_s5] sm:$0xff]  ;;  %678 = vpow2.f32 %v340_v26 }
 0x34b   :  { %vm360_vm10 = vcmp.eq.f32.partialorder %v324_v27, 0.0  ;;  %vm361_vm11 = vcmp.eq.f32.partialorder %v324_v27, 1.0  ;;  %vm325_vm12 = vcmp.gt.f32.partialorder %v324_v27, 1.0  ;;  %vm367_vm15 = vcmp.eq.f32.partialorder %v301_v29, 0.0  ;;  %s1144_s13 = smov [#allocation25]   ;;  %s1145_s5 = smov [#allocation24]  }
 0x34c   :  { %vm362_vm13 = vmor %vm360_vm10, %vm361_vm11  ;;  %v328_v31 = vmul.f32 %v327_v28, %v1567_v59  ;;  %s494_s27 = sshll.u32 %s1144_s13, 4  ;;  %s484_s8 = sshll.u32 %s1145_s5, 4  ;;  %s495_s27 = int_to_ptr.vmem [resolvable:$true] %s494_s27  ;;  %s485_s8 = int_to_ptr.vmem [resolvable:$true] %s484_s8 }
 0x34d   :  { %vm363_vm14 = vmand %vm201_vm1, %vm362_vm13  ;;  %s942_s28 = scalar_lea.vmem %s495_s27, 128  ;;  %p947_p8 = scmp.lt.s32.totalorder %s495_s27, %s495_s27 }
 0x34e   :  { %v364_v30 = vsel %vm363_vm14, 2.0, %v324_v27  ;;  %vm326_vm4 = vmand %vm202_vm2, %vm325_vm12  ;;  %p943_p7 = scmp.ne.s32.totalorder %s495_s27, %s942_s28  ;;  %p948_p9 = scmp.lt.s32.totalorder %s942_s28, %s942_s28 }
 0x34f   :  { %vm365_vm6 = vcmp.eq.f32.partialorder %v364_v30, 1.0  ;;  %v607_v32 = vsel %vm326_vm4, 1.0, %v1142_v20 }
 0x350   :  { %vm366_vm5 = vmand %vm202_vm2, %vm365_vm6  ;;  %v331_v33 = vsub.f32 1.0, %v607_v32  ;;  %p949_p10 = por %p948_p9, %p947_p8 }
 0x351   :  { %vm368_vm0 = vmand %vm366_vm5, %vm367_vm15 }
 0x352   :  { %v369_v34 = vsel %vm368_vm0, 0.0, %v364_v30  ;;  %v332_v35 = vmul.f32 %v331_v33, %v328_v31  ;;  %p950_p11 = pnand %p949_p10, %p943_p7 }
 0x353   :  { %370 = vst [vmem:[#allocation25] sm:$0xff] %v369_v34 }
 0x354   :  { %333 = vst [vmem:[#allocation24] sm:$0xff] %v332_v35 }
 0x355   :  { %953 = shalt.err (!%p950_p11)
}
 0x356   :  { %497 = dma.vmem_to_hbm [thread:$0]  %s495_s27, 128, %s1545_s16, [#allocation26]  }
 0x357   :  { %s962_s12 = scalar_lea.vmem %s485_s8, 128  ;;  %p967_p13 = scmp.lt.s32.totalorder %s485_s8, %s485_s8 }
 0x358   :  { %p963_p12 = scmp.ne.s32.totalorder %s485_s8, %s962_s12  ;;  %p968_p0 = scmp.lt.s32.totalorder %s962_s12, %s962_s12 }
 0x35a   :  { %p969_p1 = por %p968_p0, %p967_p13 }
 0x35c   :  { %p970_p2 = pnand %p969_p1, %p963_p12 }
 0x35e   :  { %973 = shalt.err (!%p970_p2)
}
 0x35f   :  { %487 = dma.vmem_to_hbm [thread:$0]  %s485_s8, 128, %s1544_s15, [#allocation23]   ;;  %v679_v36 = vpop.eup %678  ;;  %v347_v38 = vld [vmem:[#allocation13] sm:$0xff]  ;;  %v348_v40 = vld [vmem:[#allocation15] sm:$0xff]  ;;  %v351_v43 = vld [vmem:[#allocation19 + $0x8] sm:$0xff]  ;;  %v371_v46 = vstv %s1312_s29  ;;  %v377_v47 = vstv %s1316_s7  ;;  %v381_v48 = vstv %s1340_s22  ;;  %v385_v49 = vstv %s1354_s24 }
 0x360   :  { %v342_v37 = vsel %vm334_vm7, %v679_v36, %v1437_v24  ;;  %s1573_s6 = sld [smem:[#allocation50_spill]]  ;;  %v350_v42 = vld [vmem:[#allocation19] sm:$0xff]  ;;  %v352_v44 = vld [vmem:[#allocation19 + $0x10] sm:$0xff]  ;;  %v353_v45 = vld [vmem:[#allocation19 + $0x18] sm:$0xff]  ;;  %v373_v50 = vstv %s1314_s21  ;;  %v379_v51 = vstv %s1327_s1  ;;  %v383_v52 = vstv %s1344_s23  ;;  %s1146_s15 = smov [#allocation28]  }
 0x361   :  { %v344_v39 = vmul.f32 0.001, %v342_v37  ;;  %v387_v53 = vstv %s1356_s2  ;;  %s514_s25 = sshll.u32 %s1146_s15, 4  ;;  %s515_s25 = int_to_ptr.vmem [resolvable:$true] %s514_s25 }
 0x362   :  { %s982_s29 = scalar_lea.vmem %s515_s25, 128  ;;  %p987_p4 = scmp.lt.s32.totalorder %s515_s25, %s515_s25 }
 0x363   :  { %vm345_vm2 = vcmp.lt.f32.partialorder %v344_v39, 15.0  ;;  %p983_p3 = scmp.ne.s32.totalorder %s515_s25, %s982_s29  ;;  %p988_p5 = scmp.lt.s32.totalorder %s982_s29, %s982_s29 }
 0x364   :  { %vm346_vm3 = vmand %vm201_vm1, %vm345_vm2 }
 0x365   :  { %v356_v54 = vsel %vm346_vm3, %v1437_v24, %v350_v42  ;;  %v357_v55 = vsel %vm346_vm3, %v347_v38, %v351_v43  ;;  %v358_v56 = vsel %vm346_vm3, %v348_v40, %v352_v44  ;;  %p989_p6 = por %p988_p5, %p987_p4 }
 0x366   :  { %v349_v41 = vld [vmem:[%s1573_s6] sm:$0xff]  ;;  %v372_v58 = vmul.f32 %v371_v46, %v356_v54  ;;  %v378_v59 = vmul.f32 %v377_v47, %v357_v55  ;;  %v382_v60 = vmul.f32 %v381_v48, %v358_v56 }
 0x367   :  { %v359_v57 = vsel %vm346_vm3, %v349_v41, %v353_v45  ;;  %p990_p7 = pnand %p989_p6, %p983_p3 }
 0x368   :  { %v386_v61 = vmul.f32 %v385_v49, %v359_v57  ;;  %v374_v62 = vadd.f32 %v373_v50, %v372_v58  ;;  %v380_v63 = vadd.f32 %v379_v51, %v378_v59  ;;  %v1488_v0 = vadd.f32 %v383_v52, %v382_v60 }
 0x36a   :  { %v1490_v8 = vadd.f32 %v387_v53, %v386_v61  ;;  %v375_v13 = vmul.f32 1.442695, %v374_v62  ;;  %v402_v14 = vmul.f32 1.442695, %v380_v63  ;;  %v404_v15 = vsub.f32 0.0, %v380_v63  ;;  %453 = vst [vmem:[#allocation28] sm:$0xff] %v380_v63 }
 0x36b   :  { %vm409_vm1 = vcmp.eq.f32.partialorder %v1488_v0, 0.0 }
 0x36c   :  { %993 = shalt.err (!%p990_p7)
}
 0x36d   :  { %517 = dma.vmem_to_hbm [thread:$0]  %s515_s25, 128, %s1547_s18, [#allocation29]   ;;  %680 = vpow2.f32 %v375_v13  ;;  %v405_v16 = vmul.f32 1.442695, %v404_v15  ;;  %v410_v17 = vsel %vm409_vm1, 1.0, %v1488_v0  ;;  %vm446_vm7 = vcmp.gt.f32.partialorder %v1490_v8, 0.0 }
 0x36e   :  { %682 = vpow2.f32 %v402_v14  ;;  %vm447_vm8 = vcmp.lt.f32.partialorder %v1490_v8, 0.0  ;;  %v389_v18 = vmul.f32 %v1488_v0, %v1488_v0  ;;  %v390_v19 = vmul.f32 %v1490_v8, %v1490_v8  ;;  %s1147_s18 = smov [#allocation27]  }
 0x36f   :  { %684 = vpow2.f32 %v405_v16  ;;  %v448_v21 = vsel %vm447_vm8, -1.5707964, %v1142_v20  ;;  %s504_s1 = sshll.u32 %s1147_s18, 4  ;;  %s505_s1 = int_to_ptr.vmem [resolvable:$true] %s504_s1 }
 0x370   :  { %686 = vrcp.f32 %v410_v17  ;;  %v1504_v22 = vsel %vm446_vm7, 1.5707964, %v448_v21  ;;  %v391_v23 = vadd.f32 %v390_v19, %v389_v18  ;;  %s1002_s22 = scalar_lea.vmem %s505_s1, 128  ;;  %p1007_p9 = scmp.lt.s32.totalorder %s505_s1, %s505_s1 }
 0x371   :  { %p1003_p8 = scmp.ne.s32.totalorder %s505_s1, %s1002_s22  ;;  %p1008_p10 = scmp.lt.s32.totalorder %s1002_s22, %s1002_s22 }
 0x372   :  { %vm392_vm9 = vcmp.gt.f32.partialorder %v391_v23, 0.0 }
 0x373   :  { %v393_v24 = vsel %vm392_vm9, %v391_v23, 1.0  ;;  %p1009_p11 = por %p1008_p10, %p1007_p9 }
 0x374   :  { %688 = vrsqrt.f32 %v393_v24 }
 0x375   :  { %p1010_p12 = pnand %p1009_p11, %p1003_p8 }
 0x37a   :  { %v681_v1 = vpop.eup %680 }
 0x37b   :  { %v683_v2 = vpop.eup %682  ;;  %452 = vst [vmem:[#allocation27] sm:$0xff] %v681_v1  ;;  %v401_v3 = vmul.f32 0.5, %v681_v1 }
 0x37c   :  { %v685_v4 = vpop.eup %684 }
 0x37d   :  { %1013 = shalt.err (!%p1010_p12)
}
 0x37e   :  { %507 = dma.vmem_to_hbm [thread:$0]  %s505_s1, 128, %s1546_s17, [#allocation26]   ;;  %v687_v5 = vpop.eup %686  ;;  %v407_v6 = vsub.f32 %v683_v2, %v685_v4  ;;  %v395_v9 = vmul.f32 %v681_v1, %v1488_v0  ;;  %v398_v10 = vmul.f32 %v681_v1, %v1490_v8 }
 0x37f   :  { %v412_v7 = vmul.f32 %v687_v5, %v1490_v8  ;;  %s1148_s2 = smov [#allocation31]  }
 0x380   :  { %v408_v11 = vmul.f32 %v407_v6, %v401_v3  ;;  %s533_s26 = sshll.u32 %s1148_s2, 4  ;;  %s534_s26 = int_to_ptr.vmem [resolvable:$true] %s533_s26 }
 0x381   :  { %v413_v12 = vand.u32 2147483647, %v412_v7  ;;  %v689_v25 = vpop.eup %688  ;;  %s1022_s17 = scalar_lea.vmem %s534_s26, 384  ;;  %p1027_p0 = scmp.lt.s32.totalorder %s534_s26, %s534_s26 }
 0x382   :  { %457 = vst [vmem:[#allocation31 + $0x10] sm:$0xff] %v408_v11  ;;  %v396_v27 = vmul.f32 %v689_v25, %v395_v9  ;;  %v399_v29 = vmul.f32 %v689_v25, %v398_v10  ;;  %p1023_p13 = scmp.ne.s32.totalorder %s534_s26, %s1022_s17  ;;  %p1028_p1 = scmp.lt.s32.totalorder %s1022_s17, %s1022_s17 }
 0x383   :  { %v416_v26 = vmax.f32 %v413_v12, 1e-30  ;;  %v420_v28 = vadd.f32 1.0, %v413_v12 }
 0x384   :  { %v397_v30 = vsel %vm392_vm9, %v396_v27, %v681_v1  ;;  %v400_v31 = vsel %vm392_vm9, %v399_v29, 0.0  ;;  %p1029_p2 = por %p1028_p1, %p1027_p0 }
 0x385   :  { %690 = vrcp.f32 %v416_v26  ;;  %455 = vst [vmem:[#allocation31] sm:$0xff] %v397_v30  ;;  %456 = vst [vmem:[#allocation31 + $0x8] sm:$0xff] %v400_v31 }
 0x386   :  { %692 = vrcp.f32 %v420_v28  ;;  %p1030_p3 = pnand %p1029_p2, %p1023_p13 }
 0x388   :  { %1033 = shalt.err (!%p1030_p3)
}
 0x389   :  { %539 = dma.vmem_to_hbm [thread:$0]  %s534_s26, 384, %s1549_s20, [#allocation32], %s1128_s9, %s1128_s9, %s1129_s3   ;;  %v608_v32 = vadd.f32 -1.0, %v413_v12  ;;  %vm415_vm10 = vcmp.gt.f32.partialorder %v413_v12, 0.41421357  ;;  %vm443_vm12 = vcmp.ge.f32.partialorder %v1490_v8, 0.0 }
 0x38a   :  { %vm414_vm11 = vcmp.gt.f32.partialorder %v413_v12, 2.4142137  ;;  %v425_v46 = vsel %vm415_vm10, 0.7853982, %v1142_v20  ;;  %vm438_vm13 = vcmp.lt.f32.partialorder %v412_v7, 0.0  ;;  %vm442_vm14 = vcmp.lt.f32.partialorder %v1488_v0, 0.0 }
 0x38b   :  { %v426_v49 = vsel %vm414_vm11, 1.5707964, %v425_v46  ;;  %v1149_v53 = vmov -3.1415927   ;;  %s1150_s20 = smov [#allocation30]   ;;  %vm441_vm15 = vcmp.gt.f32.partialorder %v1488_v0, 0.0 }
 0x38c   :  { %v444_v54 = vsel %vm443_vm12, 3.1415927, %v1149_v53  ;;  %s524_s9 = sshll.u32 %s1150_s20, 4  ;;  %s525_s9 = int_to_ptr.vmem [resolvable:$true] %s524_s9 }
 0x38d   :  { %s1042_s3 = scalar_lea.vmem %s525_s9, 128  ;;  %p1047_p5 = scmp.lt.s32.totalorder %s525_s9, %s525_s9 }
 0x38e   :  { %p1043_p4 = scmp.ne.s32.totalorder %s525_s9, %s1042_s3  ;;  %p1048_p6 = scmp.lt.s32.totalorder %s1042_s3, %s1042_s3 }
 0x390   :  { %p1049_p7 = por %p1048_p6, %p1047_p5 }
 0x392   :  { %v691_v33 = vpop.eup %690  ;;  %p1050_p8 = pnand %p1049_p7, %p1043_p4 }
 0x393   :  { %v693_v34 = vpop.eup %692  ;;  %v418_v35 = vmul.f32 -1.0, %v691_v33 }
 0x394   :  { %v422_v36 = vmul.f32 %v693_v34, %v608_v32 }
 0x396   :  { %v423_v37 = vsel %vm415_vm10, %v422_v36, %v413_v12 }
 0x397   :  { %v424_v38 = vsel %vm414_vm11, %v418_v35, %v423_v37 }
 0x398   :  { %v427_v39 = vmul.f32 %v424_v38, %v424_v38 }
 0x39a   :  { %v428_v40 = vmul.f32 0.080537446, %v427_v39 }
 0x39c   :  { %v609_v41 = vadd.f32 -0.13877685, %v428_v40 }
 0x39e   :  { %v430_v42 = vmul.f32 %v609_v41, %v427_v39 }
 0x3a0   :  { %v431_v43 = vadd.f32 0.19977711, %v430_v42 }
 0x3a2   :  { %v432_v44 = vmul.f32 %v431_v43, %v427_v39 }
 0x3a4   :  { %v610_v45 = vadd.f32 -0.3333295, %v432_v44 }
 0x3a6   :  { %v434_v47 = vmul.f32 %v610_v45, %v427_v39 }
 0x3a8   :  { %v435_v48 = vmul.f32 %v434_v47, %v424_v38 }
 0x3aa   :  { %v436_v50 = vadd.f32 %v435_v48, %v424_v38 }
 0x3ac   :  { %v437_v51 = vadd.f32 %v436_v50, %v426_v49 }
 0x3ae   :  { %v439_v52 = vsub.f32 0.0, %v437_v51 }
 0x3b0   :  { %v440_v55 = vsel %vm438_vm13, %v439_v52, %v437_v51 }
 0x3b1   :  { %v445_v56 = vadd.f32 %v444_v54, %v440_v55 }
 0x3b3   :  { %v450_v20 = vsel %vm442_vm14, %v445_v56, %v1504_v22 }
 0x3b4   :  { %v451_v57 = vsel %vm441_vm15, %v440_v55, %v450_v20 }
 0x3b5   :  { %454 = vst [vmem:[#allocation30] sm:$0xff] %v451_v57 }
 0x3b6   :  { %1053 = shalt.err (!%p1050_p8)
}
 0x3b7   :  { %527 = dma.vmem_to_hbm [thread:$0]  %s525_s9, 128, %s1548_s19, [#allocation29]  }
 0x3b8   :  { %1096 = dma.done.wait [#allocation6], 128  }
 0x3b9   :  { %1097 = vsyncadd [#allocation6], 4294967168 }
 0x3ba   :  { %1098 = dma.done.wait [#allocation23], 256  }
 0x3bb   :  { %1099 = vsyncadd [#allocation23], 4294967040 }
 0x3bc   :  { %1100 = dma.done.wait [#allocation26], 256  }
 0x3bd   :  { %1101 = vsyncadd [#allocation26], 4294967040 }
 0x3be   :  { %1102 = dma.done.wait [#allocation29], 256  }
 0x3bf   :  { %1103 = vsyncadd [#allocation29], 4294967040 }
 0x3c0   :  { %1104 = dma.done.wait [#allocation32], 384  }
 0x3c1   :  { %1105 = vsyncadd [#allocation32], 4294966912 }
 0x3c2   :  { %564 = vsyncpa [#allocation5], 1 }
 0x3c3   :  { %565 = vsyncpa [#allocation8], 1 }
 0x3c4   :  { %566 = vsyncpa [#allocation11], 1 }
 0x3c5   :  { %567 = vsyncpa [#allocation14], 1 }
 0x3c6   :  { %568 = vsyncpa [#allocation17], 1 }
 0x3c7   :  { %569 = vsyncpa [#allocation20], 1 }
 0x3c8   :  { %570 = vsyncpa [#allocation6], 1 }
 0x3c9   :  { %571 = vsyncpa [#allocation23], 1 }
 0x3ca   :  { %572 = vsyncpa [#allocation26], 1 }
 0x3cb   :  { %573 = vsyncpa [#allocation29], 1 }
 0x3cc   :  { %574 = vsyncpa [#allocation32], 1 }

</bundles_post_ra>
